<compile_context>
chip_gen: v5e
topology: v5e:2x2
jax: 0.10.0
libtpu: 0.0.40
codegen_flags: <defaults>
</compile_context>

<pallas_src>
import functools

import jax
import jax.numpy as jnp
from jax.experimental import pallas as pl
from jax.experimental.pallas import tpu as pltpu

LEAKY_SLOPE = 0.01
BN_EPS = 1e-5
LANE = 128
SUB = 16   # sublane multiple safe for both f32 (8) and bf16 (16) tiles


def _round_up(v, m):
    return (v + m - 1) // m * m


def _vmem_budget_bytes():
    """Generation-aware VMEM budget with headroom (never the full physical)."""
    phys = 64 * 1024 * 1024  # conservative fallback (v7x per-TC size)
    try:
        info = pltpu.get_tpu_info()
        phys = int(getattr(info, "vmem_capacity_bytes", phys))
    except Exception:
        pass
    if phys <= 64 * 1024 * 1024:
        # v7x: leave ~25% headroom for compiler scratch / double-buffers.
        return (phys * 3) // 4
    # v5e / v6e: 128 MiB physical -> use up to ~100 MiB.
    return min(100 * 1024 * 1024, (phys * 25) // 32)


def _tdnn_kernel(x_ref, w_ref, b_ref, scale_ref, shift_ref, o_ref, *,
                 k, t1_blk, compute_dtype):
    """One (batch_block, time_block) tile per grid step.

    x_ref:     (B, Tin, Cp)  input rows incl. 2*(K-1) halo (compute_dtype)
    w_ref:     (K, Cp, Cp)   conv weight per tap (compute_dtype)
    b_ref:     (1, Cp)       conv bias (f32)
    scale_ref: (1, Cp)       folded BN scale = gamma * rsqrt(var + eps)
    shift_ref: (1, Cp)       folded BN shift = beta - mean * scale
    o_ref:     (B, Tout, Cp) output tile (lane-dense)
    """
    x = x_ref[...]
    w = w_ref[...]
    bias = b_ref[...]
    bsz = x.shape[0]
    cp = x.shape[-1]
    t2_blk = o_ref.shape[1]

    def conv(h, t_out):
        # Per-tap MXU matmuls accumulated in f32 — no im2col concat buffer.
        # Batch is folded into the matmul M dimension.
        acc = None
        for j in range(k):
            tap = h[:, j:j + t_out, :].reshape(bsz * t_out, cp)
            part = jnp.dot(tap, w[j], preferred_element_type=jnp.float32)
            acc = part if acc is None else acc + part
        return acc.reshape(bsz, t_out, cp) + bias          # bias added once

    h1 = conv(x, t1_blk)                                   # Conv1d #1
    h2 = conv(h1.astype(compute_dtype), t2_blk)            # Conv1d #2 (same kernel)

    h = jnp.where(h2 > 0, h2, LEAKY_SLOPE * h2)            # LeakyReLU (f32 epilogue)
    # TODO(synk): dropout implemented as identity (eval mode); training-mode
    # stochastic mask is not reproducible against torch RNG.
    y = h * scale_ref[...] + shift_ref[...]                 # eval-mode BatchNorm1d (folded)
    o_ref[...] = y.astype(o_ref.dtype)


def tdnn_forward(x, w_kio, bias, gamma, beta, run_mean, run_var, *,
                 context_size, compute_dtype=jnp.float32, out_dtype=None,
                 batch_block=None, time_block=None):
    """x: (N, T, C) f32; returns (N, T - 2*(K-1), C) in out_dtype (default f32)."""
    n, t, c = x.shape
    k = context_size
    t2 = t - 2 * (k - 1)          # output length after two valid convolutions
    assert t2 > 0, "sequence too short for two convolutions"
    assert w_kio.shape == (k, c, c)
    if out_dtype is None:
        out_dtype = jnp.float32

    # Lane-dense channels.  NOTE (review): with small C (e.g. 16) padded to 128
    # the MXU multiplies mostly zeros ((128/16)^2 = 64x FLOP inflation) — this
    # regime is epilogue/copy-bound, not MXU-bound.  Production C that pads to
    # a multiple of 256 fills the v6e/v7x MXU N dimension fully.
    cp = _round_up(c, LANE)
    t2p = _round_up(t2, SUB)
    itm = jnp.dtype(compute_dtype).itemsize
    out_itm = jnp.dtype(out_dtype).itemsize

    budget = _vmem_budget_bytes()
    fit_budget = (budget * 7) // 8   # block-sizing margin under the requested limit

    def est_cost(bb, t2b, single_consts=True):
        # Rough per-step VMEM estimate (double-buffered in/out blocks,
        # constants, f32 accumulators + tap-slice/epilogue temporaries).
        t1b = t2b + (k - 1)
        tib = _round_up(t2b + 2 * (k - 1), SUB)
        in_b = 2 * bb * tib * cp * itm
        out_b = 2 * bb * t2b * cp * out_itm
        const_b = (k * cp * cp * itm + 3 * cp * 4) * (1 if single_consts else 2)
        interm = bb * cp * (t1b * (4 + 2 * itm) + t2b * (3 * 4 + 2 * itm))
        return in_b + out_b + const_b + interm

    # ---- time tile: largest that fits with batch_block=1 (unless overridden).
    if time_block is not None:
        t2b = _round_up(min(max(time_block, 1), t2p), SUB)
    else:
        t2b = t2p
        while t2b > SUB and est_cost(1, t2b) > fit_budget:
            t2b = max(SUB, _round_up(t2b // 2, SUB))
    nt = -(-t2 // t2b)

    # ---- batch block: fit VMEM, target M = batch_block * t2b >= ~512 rows,
    # keep >= 2 total grid steps when possible (dual-TC load balance).
    if batch_block is None:
        bb_fit = 1
        while bb_fit < n and est_cost(bb_fit * 2, t2b) <= fit_budget:
            bb_fit *= 2
        bb_target = max(1, -(-512 // t2b))
        bb_grid = n if (nt >= 2 or n < 2) else max(1, n // 2)
        batch_block = max(1, min(n, bb_fit, bb_grid, bb_target))
    n_pad = _round_up(n, batch_block)

    t1b = t2b + (k - 1)                                 # conv1 rows needed per tile
    tib = _round_up(t2b + 2 * (k - 1), SUB)             # input rows per tile (halo incl.)
    tp_total = (nt - 1) * t2b + tib                     # padded full-sequence length

    # ---- wrapper-side halo: overlapping time tiles (halo = 2*(K-1) rows).
    # Valid outputs only ever read real input rows; padded rows feed only
    # positions that are sliced off at the end.
    x_pad = jnp.pad(x, ((0, n_pad - n), (0, tp_total - t), (0, cp - c)))
    x_pad = x_pad.astype(compute_dtype)
    x_tiles = jnp.stack(
        [x_pad[:, j * t2b:j * t2b + tib, :] for j in range(nt)], axis=1)
    # x_tiles: (n_pad, nt, tib, cp)

    # Weight (K, C_in, C_out) padded per tap; kept 3-D for per-tap matmuls.
    w_pad = jnp.pad(w_kio, ((0, 0), (0, cp - c), (0, cp - c))).astype(compute_dtype)
    b_pad = jnp.pad(bias.reshape(1, c), ((0, 0), (0, cp - c))).astype(jnp.float32)

    # Fold eval-mode BatchNorm1d into scale/shift (no rsqrt in the kernel).
    scale = gamma.reshape(1, c) * jax.lax.rsqrt(run_var.reshape(1, c) + BN_EPS)
    shift = beta.reshape(1, c) - run_mean.reshape(1, c) * scale
    scale = jnp.pad(scale, ((0, 0), (0, cp - c))).astype(jnp.float32)
    shift = jnp.pad(shift, ((0, 0), (0, cp - c))).astype(jnp.float32)

    kern = functools.partial(_tdnn_kernel, k=k, t1_blk=t1b,
                             compute_dtype=compute_dtype)

    def run(single_buffer_consts):
        def const_spec(shape, imap):
            # Constant index_map => no need to double-buffer these blocks.
            if single_buffer_consts:
                return pl.BlockSpec(shape, imap, pipeline_mode=pl.Buffered(1))
            return pl.BlockSpec(shape, imap)

        return pl.pallas_call(
            kern,
            out_shape=jax.ShapeDtypeStruct((n_pad, nt, t2b, cp), out_dtype),
            grid_spec=pltpu.PrefetchScalarGridSpec(
                num_scalar_prefetch=0,
                grid=(n_pad // batch_block, nt),
                in_specs=[
                    pl.BlockSpec((batch_block, None, tib, cp),
                                 lambda i, j: (i, j, 0, 0)),                  # x tiles
                    const_spec((k, cp, cp), lambda i, j: (0, 0, 0)),          # conv weight
                    const_spec((1, cp), lambda i, j: (0, 0)),                 # conv bias
                    const_spec((1, cp), lambda i, j: (0, 0)),                 # bn scale
                    const_spec((1, cp), lambda i, j: (0, 0)),                 # bn shift
                ],
                out_specs=pl.BlockSpec((batch_block, None, t2b, cp),
                                       lambda i, j: (i, j, 0, 0)),
            ),
            compiler_params=pltpu.CompilerParams(
                dimension_semantics=("parallel", "parallel"),
                vmem_limit_bytes=int(budget)),
        )(x_tiles, w_pad, b_pad, scale, shift)

    try:
        out_pad = run(True)            # single-buffered constants
    except Exception:
        out_pad = run(False)           # fallback: default double buffering

    out = out_pad.reshape(n_pad, nt * t2b, cp)
    return out[:n, :t2, :c]


def _reference(x, w_kio, bias, gamma, beta, run_mean, run_var, *, context_size):
    """Pure-JAX reference (same eval-mode semantics, per-tap accumulation)."""
    k = context_size

    def conv(h):
        t_out = h.shape[1] - (k - 1)
        out = jnp.zeros((h.shape[0], t_out, bias.shape[-1]), jnp.float32) + bias
        for kk in range(k):
            out = out + jnp.einsum('nti,io->nto', h[:, kk:kk + t_out, :], w_kio[kk])
        return out

    h = conv(conv(x))
    h = jnp.where(h > 0, h, LEAKY_SLOPE * h)
    return (h - run_mean) * jax.lax.rsqrt(run_var + BN_EPS) * gamma + beta


if __name__ == "__main__":
    # Small shapes consistent with the module (double application of the same
    # Conv1d forces input_dim == output_dim).
    N, T, C, K = 2, 16, 16, 3

    key = jax.random.PRNGKey(0)
    kx, kw, kb, kg, kbeta, km, kv, kx2 = jax.random.split(key, 8)

    x = jax.random.normal(kx, (N, T, C), dtype=jnp.float32)

    # Conv1d init ~ PyTorch: uniform(-bound, bound), bound = 1/sqrt(C_in * K).
    bound = 1.0 / (C * K) ** 0.5
    # Stored as (K, C_in, C_out)  <->  torch weight (C_out, C_in, K) transposed.
    w_kio = jax.random.uniform(kw, (K, C, C), jnp.float32, -bound, bound)
    bias = jax.random.uniform(kb, (1, C), jnp.float32, -bound, bound)

    # BatchNorm1d eval-mode params / running stats (randomized to exercise folding).
    gamma = 1.0 + 0.1 * jax.random.normal(kg, (1, C), jnp.float32)
    beta = 0.05 * jax.random.normal(kbeta, (1, C), jnp.float32)
    run_mean = 0.1 * jax.random.normal(km, (1, C), jnp.float32)
    run_var = jax.random.uniform(kv, (1, C), jnp.float32, 0.5, 1.5)

    ref = _reference(x, w_kio, bias, gamma, beta, run_mean, run_var,
                     context_size=K)

    # 1) f32 operand path (baseline precision, default block sizing).
    out_f32 = tdnn_forward(x, w_kio, bias, gamma, beta, run_mean, run_var,
                           context_size=K, compute_dtype=jnp.float32)
    out_f32 = jax.block_until_ready(out_f32)
    assert out_f32.shape == (N, T - 2 * (K - 1), C), out_f32.shape
    assert jnp.allclose(out_f32, ref, atol=2e-4, rtol=2e-4), "f32 mismatch vs reference"

    # 2) bf16 MXU-operand path with bf16 output (v6e/v7x fast path; f32 accumulation).
    out_bf16 = tdnn_forward(x, w_kio, bias, gamma, beta, run_mean, run_var,
                            context_size=K, compute_dtype=jnp.bfloat16,
                            out_dtype=jnp.bfloat16)
    out_bf16 = jax.block_until_ready(out_bf16)
    assert out_bf16.shape == (N, T - 2 * (K - 1), C), out_bf16.shape
    assert out_bf16.dtype == jnp.bfloat16
    assert jnp.allclose(out_bf16.astype(jnp.float32), ref, atol=5e-2, rtol=5e-2), \
        "bf16 mismatch vs reference"

    # 3) Longer sequence with a forced small time tile: exercises the
    #    halo-tiled (batch, time) grid (multiple time blocks per batch element).
    T2 = 80
    x_long = jax.random.normal(kx2, (N, T2, C), dtype=jnp.float32)
    ref_long = _reference(x_long, w_kio, bias, gamma, beta, run_mean, run_var,
                          context_size=K)
    out_long = tdnn_forward(x_long, w_kio, bias, gamma, beta, run_mean, run_var,
                            context_size=K, compute_dtype=jnp.float32,
                            time_block=16)
    out_long = jax.block_until_ready(out_long)
    assert out_long.shape == (N, T2 - 2 * (K - 1), C), out_long.shape
    assert jnp.allclose(out_long, ref_long, atol=2e-4, rtol=2e-4), \
        "time-tiled mismatch vs reference"

    print("KERNEL_OK")
</pallas_src>

<mosaic_0001>
module attributes {stable_mosaic.version = 11 : i64} {
  func.func @_tdnn_kernel(%arg0: i32, %arg1: i32, %arg2: memref<1x1x32x128xf32, #tpu.memory_space<vmem>>, %arg3: memref<3x128x128xf32, #tpu.memory_space<vmem>>, %arg4: memref<1x128xf32, #tpu.memory_space<vmem>>, %arg5: memref<1x128xf32, #tpu.memory_space<vmem>>, %arg6: memref<1x128xf32, #tpu.memory_space<vmem>>, %arg7: memref<1x1x16x128xf32, #tpu.memory_space<vmem>>) attributes {dimension_semantics = [#tpu.dimension_semantics<parallel>, #tpu.dimension_semantics<parallel>], iteration_bounds = array<i64: 2, 1>, scalar_prefetch = 0 : i64, scratch_operands = 0 : i64, tpu.core_type = #tpu.core_type<tc>, window_params = [{transform_indices = @transform_0, window_bounds = array<i64: 1, 1, 32, 128>}, {pipeline_mode = #tpu.pipeline_mode<synchronous>, transform_indices = @transform_1, window_bounds = array<i64: 3, 128, 128>}, {pipeline_mode = #tpu.pipeline_mode<synchronous>, transform_indices = @transform_2, window_bounds = array<i64: 1, 128>}, {pipeline_mode = #tpu.pipeline_mode<synchronous>, transform_indices = @transform_3, window_bounds = array<i64: 1, 128>}, {pipeline_mode = #tpu.pipeline_mode<synchronous>, transform_indices = @transform_4, window_bounds = array<i64: 1, 128>}, {transform_indices = @transform_5, window_bounds = array<i64: 1, 1, 16, 128>}]} {
    %c0 = arith.constant 0 : index
    %c0_0 = arith.constant 0 : index
    %c0_1 = arith.constant 0 : index
    %c0_2 = arith.constant 0 : index
    %0 = vector.load %arg2[%c0, %c0_0, %c0_1, %c0_2] : memref<1x1x32x128xf32, #tpu.memory_space<vmem>>, vector<1x1x32x128xf32>
    %1 = vector.shape_cast %0 : vector<1x1x32x128xf32> to vector<1x32x128xf32>
    %c0_3 = arith.constant 0 : index
    %c0_4 = arith.constant 0 : index
    %c0_5 = arith.constant 0 : index
    %2 = vector.load %arg3[%c0_3, %c0_4, %c0_5] : memref<3x128x128xf32, #tpu.memory_space<vmem>>, vector<3x128x128xf32>
    %c0_6 = arith.constant 0 : index
    %c0_7 = arith.constant 0 : index
    %3 = vector.load %arg4[%c0_6, %c0_7] : memref<1x128xf32, #tpu.memory_space<vmem>>, vector<1x128xf32>
    %4 = vector.extract_strided_slice %1 {offsets = [0, 0, 0], sizes = [1, 18, 128], strides = [1, 1, 1]} : vector<1x32x128xf32> to vector<1x18x128xf32>
    %5 = vector.shape_cast %4 : vector<1x18x128xf32> to vector<18x128xf32>
    %6 = vector.extract_strided_slice %2 {offsets = [0, 0, 0], sizes = [1, 128, 128], strides = [1, 1, 1]} : vector<3x128x128xf32> to vector<1x128x128xf32>
    %7 = vector.shape_cast %6 : vector<1x128x128xf32> to vector<128x128xf32>
    %cst = arith.constant dense<0.000000e+00> : vector<18x128xf32>
    %8 = tpu.matmul %5, %7, %cst {dimension_numbers = #tpu.dot_dimension_numbers<[1], [0], [0], [1], [0, 0, 1, 1], [], []>} : vector<18x128xf32>, vector<128x128xf32>, vector<18x128xf32> -> vector<18x128xf32>
    %9 = vector.extract_strided_slice %1 {offsets = [0, 1, 0], sizes = [1, 18, 128], strides = [1, 1, 1]} : vector<1x32x128xf32> to vector<1x18x128xf32>
    %10 = vector.shape_cast %9 : vector<1x18x128xf32> to vector<18x128xf32>
    %11 = vector.extract_strided_slice %2 {offsets = [1, 0, 0], sizes = [1, 128, 128], strides = [1, 1, 1]} : vector<3x128x128xf32> to vector<1x128x128xf32>
    %12 = vector.shape_cast %11 : vector<1x128x128xf32> to vector<128x128xf32>
    %cst_8 = arith.constant dense<0.000000e+00> : vector<18x128xf32>
    %13 = tpu.matmul %10, %12, %cst_8 {dimension_numbers = #tpu.dot_dimension_numbers<[1], [0], [0], [1], [0, 0, 1, 1], [], []>} : vector<18x128xf32>, vector<128x128xf32>, vector<18x128xf32> -> vector<18x128xf32>
    %14 = arith.addf %8, %13 : vector<18x128xf32>
    %15 = vector.extract_strided_slice %1 {offsets = [0, 2, 0], sizes = [1, 18, 128], strides = [1, 1, 1]} : vector<1x32x128xf32> to vector<1x18x128xf32>
    %16 = vector.shape_cast %15 : vector<1x18x128xf32> to vector<18x128xf32>
    %17 = vector.extract_strided_slice %2 {offsets = [2, 0, 0], sizes = [1, 128, 128], strides = [1, 1, 1]} : vector<3x128x128xf32> to vector<1x128x128xf32>
    %18 = vector.shape_cast %17 : vector<1x128x128xf32> to vector<128x128xf32>
    %cst_9 = arith.constant dense<0.000000e+00> : vector<18x128xf32>
    %19 = tpu.matmul %16, %18, %cst_9 {dimension_numbers = #tpu.dot_dimension_numbers<[1], [0], [0], [1], [0, 0, 1, 1], [], []>} : vector<18x128xf32>, vector<128x128xf32>, vector<18x128xf32> -> vector<18x128xf32>
    %20 = arith.addf %14, %19 : vector<18x128xf32>
    %21 = vector.shape_cast %20 : vector<18x128xf32> to vector<1x18x128xf32>
    %22 = vector.shape_cast %3 : vector<1x128xf32> to vector<1x1x128xf32>
    %23 = vector.broadcast %22 : vector<1x1x128xf32> to vector<1x18x128xf32>
    %24 = arith.addf %21, %23 : vector<1x18x128xf32>
    %25 = vector.extract_strided_slice %24 {offsets = [0, 0, 0], sizes = [1, 16, 128], strides = [1, 1, 1]} : vector<1x18x128xf32> to vector<1x16x128xf32>
    %26 = vector.shape_cast %25 : vector<1x16x128xf32> to vector<16x128xf32>
    %27 = vector.extract_strided_slice %2 {offsets = [0, 0, 0], sizes = [1, 128, 128], strides = [1, 1, 1]} : vector<3x128x128xf32> to vector<1x128x128xf32>
    %28 = vector.shape_cast %27 : vector<1x128x128xf32> to vector<128x128xf32>
    %cst_10 = arith.constant dense<0.000000e+00> : vector<16x128xf32>
    %29 = tpu.matmul %26, %28, %cst_10 {dimension_numbers = #tpu.dot_dimension_numbers<[1], [0], [0], [1], [0, 0, 1, 1], [], []>} : vector<16x128xf32>, vector<128x128xf32>, vector<16x128xf32> -> vector<16x128xf32>
    %30 = vector.extract_strided_slice %24 {offsets = [0, 1, 0], sizes = [1, 16, 128], strides = [1, 1, 1]} : vector<1x18x128xf32> to vector<1x16x128xf32>
    %31 = vector.shape_cast %30 : vector<1x16x128xf32> to vector<16x128xf32>
    %32 = vector.extract_strided_slice %2 {offsets = [1, 0, 0], sizes = [1, 128, 128], strides = [1, 1, 1]} : vector<3x128x128xf32> to vector<1x128x128xf32>
    %33 = vector.shape_cast %32 : vector<1x128x128xf32> to vector<128x128xf32>
    %cst_11 = arith.constant dense<0.000000e+00> : vector<16x128xf32>
    %34 = tpu.matmul %31, %33, %cst_11 {dimension_numbers = #tpu.dot_dimension_numbers<[1], [0], [0], [1], [0, 0, 1, 1], [], []>} : vector<16x128xf32>, vector<128x128xf32>, vector<16x128xf32> -> vector<16x128xf32>
    %35 = arith.addf %29, %34 : vector<16x128xf32>
    %36 = vector.extract_strided_slice %24 {offsets = [0, 2, 0], sizes = [1, 16, 128], strides = [1, 1, 1]} : vector<1x18x128xf32> to vector<1x16x128xf32>
    %37 = vector.shape_cast %36 : vector<1x16x128xf32> to vector<16x128xf32>
    %38 = vector.extract_strided_slice %2 {offsets = [2, 0, 0], sizes = [1, 128, 128], strides = [1, 1, 1]} : vector<3x128x128xf32> to vector<1x128x128xf32>
    %39 = vector.shape_cast %38 : vector<1x128x128xf32> to vector<128x128xf32>
    %cst_12 = arith.constant dense<0.000000e+00> : vector<16x128xf32>
    %40 = tpu.matmul %37, %39, %cst_12 {dimension_numbers = #tpu.dot_dimension_numbers<[1], [0], [0], [1], [0, 0, 1, 1], [], []>} : vector<16x128xf32>, vector<128x128xf32>, vector<16x128xf32> -> vector<16x128xf32>
    %41 = arith.addf %35, %40 : vector<16x128xf32>
    %42 = vector.shape_cast %41 : vector<16x128xf32> to vector<1x16x128xf32>
    %43 = vector.shape_cast %3 : vector<1x128xf32> to vector<1x1x128xf32>
    %44 = vector.broadcast %43 : vector<1x1x128xf32> to vector<1x16x128xf32>
    %45 = arith.addf %42, %44 : vector<1x16x128xf32>
    %cst_13 = arith.constant 0.000000e+00 : f32
    %46 = vector.broadcast %cst_13 : f32 to vector<1x16x128xf32>
    %47 = arith.cmpf ogt, %45, %46 : vector<1x16x128xf32>
    %cst_14 = arith.constant 0.00999999977 : f32
    %48 = vector.broadcast %cst_14 : f32 to vector<1x16x128xf32>
    %49 = arith.mulf %48, %45 : vector<1x16x128xf32>
    %50 = arith.select %47, %45, %49 : vector<1x16x128xi1>, vector<1x16x128xf32>
    %c0_15 = arith.constant 0 : index
    %c0_16 = arith.constant 0 : index
    %51 = vector.load %arg5[%c0_15, %c0_16] : memref<1x128xf32, #tpu.memory_space<vmem>>, vector<1x128xf32>
    %52 = vector.shape_cast %51 : vector<1x128xf32> to vector<1x1x128xf32>
    %53 = vector.broadcast %52 : vector<1x1x128xf32> to vector<1x16x128xf32>
    %54 = arith.mulf %50, %53 : vector<1x16x128xf32>
    %c0_17 = arith.constant 0 : index
    %c0_18 = arith.constant 0 : index
    %55 = vector.load %arg6[%c0_17, %c0_18] : memref<1x128xf32, #tpu.memory_space<vmem>>, vector<1x128xf32>
    %56 = vector.shape_cast %55 : vector<1x128xf32> to vector<1x1x128xf32>
    %57 = vector.broadcast %56 : vector<1x1x128xf32> to vector<1x16x128xf32>
    %58 = arith.addf %54, %57 : vector<1x16x128xf32>
    %c0_19 = arith.constant 0 : index
    %c0_20 = arith.constant 0 : index
    %c0_21 = arith.constant 0 : index
    %c0_22 = arith.constant 0 : index
    %59 = vector.load %arg7[%c0_19, %c0_20, %c0_21, %c0_22] : memref<1x1x16x128xf32, #tpu.memory_space<vmem>>, vector<1x1x16x128xf32>
    %60 = vector.shape_cast %59 : vector<1x1x16x128xf32> to vector<1x16x128xf32>
    %61 = vector.shape_cast %58 : vector<1x16x128xf32> to vector<1x1x16x128xf32>
    tpu.vector_store %arg7[%c0_19, %c0_20, %c0_21, %c0_22], %61 {strides = array<i32>} : memref<1x1x16x128xf32, #tpu.memory_space<vmem>>, vector<1x1x16x128xf32>,
    return
  }
  func.func @transform_0(%arg0: i32, %arg1: i32) -> (i32, i32, i32, i32) {
    %c0_i32 = arith.constant 0 : i32
    %c0_i32_0 = arith.constant 0 : i32
    %c0_i32_1 = arith.constant 0 : i32
    return %arg0, %arg1, %c0_i32, %c0_i32_0 : i32, i32, i32, i32
  }
  func.func @transform_1(%arg0: i32, %arg1: i32) -> (i32, i32, i32) {
    %c0_i32 = arith.constant 0 : i32
    %c0_i32_0 = arith.constant 0 : i32
    %c0_i32_1 = arith.constant 0 : i32
    %c0_i32_2 = arith.constant 0 : i32
    return %c0_i32, %c0_i32_0, %c0_i32_1 : i32, i32, i32
  }
  func.func @transform_2(%arg0: i32, %arg1: i32) -> (i32, i32) {
    %c0_i32 = arith.constant 0 : i32
    %c0_i32_0 = arith.constant 0 : i32
    %c0_i32_1 = arith.constant 0 : i32
    return %c0_i32, %c0_i32_0 : i32, i32
  }
  func.func @transform_3(%arg0: i32, %arg1: i32) -> (i32, i32) {
    %c0_i32 = arith.constant 0 : i32
    %c0_i32_0 = arith.constant 0 : i32
    %c0_i32_1 = arith.constant 0 : i32
    return %c0_i32, %c0_i32_0 : i32, i32
  }
  func.func @transform_4(%arg0: i32, %arg1: i32) -> (i32, i32) {
    %c0_i32 = arith.constant 0 : i32
    %c0_i32_0 = arith.constant 0 : i32
    %c0_i32_1 = arith.constant 0 : i32
    return %c0_i32, %c0_i32_0 : i32, i32
  }
  func.func @transform_5(%arg0: i32, %arg1: i32) -> (i32, i32, i32, i32) {
    %c0_i32 = arith.constant 0 : i32
    %c0_i32_0 = arith.constant 0 : i32
    %c0_i32_1 = arith.constant 0 : i32
    return %arg0, %arg1, %c0_i32, %c0_i32_0 : i32, i32, i32, i32
  }
}

module attributes {stable_mosaic.version = 11 : i64} {
  func.func @_tdnn_kernel(%arg0: i32, %arg1: i32, %arg2: memref<1x1x32x128xf32, #tpu.memory_space<vmem>>, %arg3: memref<3x128x128xf32, #tpu.memory_space<vmem>>, %arg4: memref<1x128xf32, #tpu.memory_space<vmem>>, %arg5: memref<1x128xf32, #tpu.memory_space<vmem>>, %arg6: memref<1x128xf32, #tpu.memory_space<vmem>>, %arg7: memref<1x1x16x128xf32, #tpu.memory_space<vmem>>) attributes {dimension_semantics = [#tpu.dimension_semantics<parallel>, #tpu.dimension_semantics<parallel>], iteration_bounds = array<i64: 2, 1>, scalar_prefetch = 0 : i64, scratch_operands = 0 : i64, tpu.core_type = #tpu.core_type<tc>, window_params = [{transform_indices = @transform_0, window_bounds = array<i64: 1, 1, 32, 128>}, {pipeline_mode = #tpu.pipeline_mode<synchronous>, transform_indices = @transform_1, window_bounds = array<i64: 3, 128, 128>}, {pipeline_mode = #tpu.pipeline_mode<synchronous>, transform_indices = @transform_2, window_bounds = array<i64: 1, 128>}, {pipeline_mode = #tpu.pipeline_mode<synchronous>, transform_indices = @transform_3, window_bounds = array<i64: 1, 128>}, {pipeline_mode = #tpu.pipeline_mode<synchronous>, transform_indices = @transform_4, window_bounds = array<i64: 1, 128>}, {transform_indices = @transform_5, window_bounds = array<i64: 1, 1, 16, 128>}]} {
    %c0 = arith.constant 0 : index
    %c0_0 = arith.constant 0 : index
    %c0_1 = arith.constant 0 : index
    %c0_2 = arith.constant 0 : index
    %0 = vector.load %arg2[%c0, %c0_0, %c0_1, %c0_2] : memref<1x1x32x128xf32, #tpu.memory_space<vmem>>, vector<1x1x32x128xf32>
    %1 = vector.shape_cast %0 : vector<1x1x32x128xf32> to vector<1x32x128xf32>
    %c0_3 = arith.constant 0 : index
    %c0_4 = arith.constant 0 : index
    %c0_5 = arith.constant 0 : index
    %2 = vector.load %arg3[%c0_3, %c0_4, %c0_5] : memref<3x128x128xf32, #tpu.memory_space<vmem>>, vector<3x128x128xf32>
    %c0_6 = arith.constant 0 : index
    %c0_7 = arith.constant 0 : index
    %3 = vector.load %arg4[%c0_6, %c0_7] : memref<1x128xf32, #tpu.memory_space<vmem>>, vector<1x128xf32>
    %4 = vector.extract_strided_slice %1 {offsets = [0, 0, 0], sizes = [1, 18, 128], strides = [1, 1, 1]} : vector<1x32x128xf32> to vector<1x18x128xf32>
    %5 = vector.shape_cast %4 : vector<1x18x128xf32> to vector<18x128xf32>
    %6 = vector.extract_strided_slice %2 {offsets = [0, 0, 0], sizes = [1, 128, 128], strides = [1, 1, 1]} : vector<3x128x128xf32> to vector<1x128x128xf32>
    %7 = vector.shape_cast %6 : vector<1x128x128xf32> to vector<128x128xf32>
    %cst = arith.constant dense<0.000000e+00> : vector<18x128xf32>
    %8 = tpu.matmul %5, %7, %cst {dimension_numbers = #tpu.dot_dimension_numbers<[1], [0], [0], [1], [0, 0, 1, 1], [], []>} : vector<18x128xf32>, vector<128x128xf32>, vector<18x128xf32> -> vector<18x128xf32>
    %9 = vector.extract_strided_slice %1 {offsets = [0, 1, 0], sizes = [1, 18, 128], strides = [1, 1, 1]} : vector<1x32x128xf32> to vector<1x18x128xf32>
    %10 = vector.shape_cast %9 : vector<1x18x128xf32> to vector<18x128xf32>
    %11 = vector.extract_strided_slice %2 {offsets = [1, 0, 0], sizes = [1, 128, 128], strides = [1, 1, 1]} : vector<3x128x128xf32> to vector<1x128x128xf32>
    %12 = vector.shape_cast %11 : vector<1x128x128xf32> to vector<128x128xf32>
    %cst_8 = arith.constant dense<0.000000e+00> : vector<18x128xf32>
    %13 = tpu.matmul %10, %12, %cst_8 {dimension_numbers = #tpu.dot_dimension_numbers<[1], [0], [0], [1], [0, 0, 1, 1], [], []>} : vector<18x128xf32>, vector<128x128xf32>, vector<18x128xf32> -> vector<18x128xf32>
    %14 = arith.addf %8, %13 : vector<18x128xf32>
    %15 = vector.extract_strided_slice %1 {offsets = [0, 2, 0], sizes = [1, 18, 128], strides = [1, 1, 1]} : vector<1x32x128xf32> to vector<1x18x128xf32>
    %16 = vector.shape_cast %15 : vector<1x18x128xf32> to vector<18x128xf32>
    %17 = vector.extract_strided_slice %2 {offsets = [2, 0, 0], sizes = [1, 128, 128], strides = [1, 1, 1]} : vector<3x128x128xf32> to vector<1x128x128xf32>
    %18 = vector.shape_cast %17 : vector<1x128x128xf32> to vector<128x128xf32>
    %cst_9 = arith.constant dense<0.000000e+00> : vector<18x128xf32>
    %19 = tpu.matmul %16, %18, %cst_9 {dimension_numbers = #tpu.dot_dimension_numbers<[1], [0], [0], [1], [0, 0, 1, 1], [], []>} : vector<18x128xf32>, vector<128x128xf32>, vector<18x128xf32> -> vector<18x128xf32>
    %20 = arith.addf %14, %19 : vector<18x128xf32>
    %21 = vector.shape_cast %20 : vector<18x128xf32> to vector<1x18x128xf32>
    %22 = vector.shape_cast %3 : vector<1x128xf32> to vector<1x1x128xf32>
    %23 = vector.broadcast %22 : vector<1x1x128xf32> to vector<1x18x128xf32>
    %24 = arith.addf %21, %23 : vector<1x18x128xf32>
    %25 = vector.extract_strided_slice %24 {offsets = [0, 0, 0], sizes = [1, 16, 128], strides = [1, 1, 1]} : vector<1x18x128xf32> to vector<1x16x128xf32>
    %26 = vector.shape_cast %25 : vector<1x16x128xf32> to vector<16x128xf32>
    %27 = vector.extract_strided_slice %2 {offsets = [0, 0, 0], sizes = [1, 128, 128], strides = [1, 1, 1]} : vector<3x128x128xf32> to vector<1x128x128xf32>
    %28 = vector.shape_cast %27 : vector<1x128x128xf32> to vector<128x128xf32>
    %cst_10 = arith.constant dense<0.000000e+00> : vector<16x128xf32>
    %29 = tpu.matmul %26, %28, %cst_10 {dimension_numbers = #tpu.dot_dimension_numbers<[1], [0], [0], [1], [0, 0, 1, 1], [], []>} : vector<16x128xf32>, vector<128x128xf32>, vector<16x128xf32> -> vector<16x128xf32>
    %30 = vector.extract_strided_slice %24 {offsets = [0, 1, 0], sizes = [1, 16, 128], strides = [1, 1, 1]} : vector<1x18x128xf32> to vector<1x16x128xf32>
    %31 = vector.shape_cast %30 : vector<1x16x128xf32> to vector<16x128xf32>
    %32 = vector.extract_strided_slice %2 {offsets = [1, 0, 0], sizes = [1, 128, 128], strides = [1, 1, 1]} : vector<3x128x128xf32> to vector<1x128x128xf32>
    %33 = vector.shape_cast %32 : vector<1x128x128xf32> to vector<128x128xf32>
    %cst_11 = arith.constant dense<0.000000e+00> : vector<16x128xf32>
    %34 = tpu.matmul %31, %33, %cst_11 {dimension_numbers = #tpu.dot_dimension_numbers<[1], [0], [0], [1], [0, 0, 1, 1], [], []>} : vector<16x128xf32>, vector<128x128xf32>, vector<16x128xf32> -> vector<16x128xf32>
    %35 = arith.addf %29, %34 : vector<16x128xf32>
    %36 = vector.extract_strided_slice %24 {offsets = [0, 2, 0], sizes = [1, 16, 128], strides = [1, 1, 1]} : vector<1x18x128xf32> to vector<1x16x128xf32>
    %37 = vector.shape_cast %36 : vector<1x16x128xf32> to vector<16x128xf32>
    %38 = vector.extract_strided_slice %2 {offsets = [2, 0, 0], sizes = [1, 128, 128], strides = [1, 1, 1]} : vector<3x128x128xf32> to vector<1x128x128xf32>
    %39 = vector.shape_cast %38 : vector<1x128x128xf32> to vector<128x128xf32>
    %cst_12 = arith.constant dense<0.000000e+00> : vector<16x128xf32>
    %40 = tpu.matmul %37, %39, %cst_12 {dimension_numbers = #tpu.dot_dimension_numbers<[1], [0], [0], [1], [0, 0, 1, 1], [], []>} : vector<16x128xf32>, vector<128x128xf32>, vector<16x128xf32> -> vector<16x128xf32>
    %41 = arith.addf %35, %40 : vector<16x128xf32>
    %42 = vector.shape_cast %41 : vector<16x128xf32> to vector<1x16x128xf32>
    %43 = vector.shape_cast %3 : vector<1x128xf32> to vector<1x1x128xf32>
    %44 = vector.broadcast %43 : vector<1x1x128xf32> to vector<1x16x128xf32>
    %45 = arith.addf %42, %44 : vector<1x16x128xf32>
    %cst_13 = arith.constant 0.000000e+00 : f32
    %46 = vector.broadcast %cst_13 : f32 to vector<1x16x128xf32>
    %47 = arith.cmpf ogt, %45, %46 : vector<1x16x128xf32>
    %cst_14 = arith.constant 0.00999999977 : f32
    %48 = vector.broadcast %cst_14 : f32 to vector<1x16x128xf32>
    %49 = arith.mulf %48, %45 : vector<1x16x128xf32>
    %50 = arith.select %47, %45, %49 : vector<1x16x128xi1>, vector<1x16x128xf32>
    %c0_15 = arith.constant 0 : index
    %c0_16 = arith.constant 0 : index
    %51 = vector.load %arg5[%c0_15, %c0_16] : memref<1x128xf32, #tpu.memory_space<vmem>>, vector<1x128xf32>
    %52 = vector.shape_cast %51 : vector<1x128xf32> to vector<1x1x128xf32>
    %53 = vector.broadcast %52 : vector<1x1x128xf32> to vector<1x16x128xf32>
    %54 = arith.mulf %50, %53 : vector<1x16x128xf32>
    %c0_17 = arith.constant 0 : index
    %c0_18 = arith.constant 0 : index
    %55 = vector.load %arg6[%c0_17, %c0_18] : memref<1x128xf32, #tpu.memory_space<vmem>>, vector<1x128xf32>
    %56 = vector.shape_cast %55 : vector<1x128xf32> to vector<1x1x128xf32>
    %57 = vector.broadcast %56 : vector<1x1x128xf32> to vector<1x16x128xf32>
    %58 = arith.addf %54, %57 : vector<1x16x128xf32>
    %c0_19 = arith.constant 0 : index
    %c0_20 = arith.constant 0 : index
    %c0_21 = arith.constant 0 : index
    %c0_22 = arith.constant 0 : index
    %59 = vector.load %arg7[%c0_19, %c0_20, %c0_21, %c0_22] : memref<1x1x16x128xf32, #tpu.memory_space<vmem>>, vector<1x1x16x128xf32>
    %60 = vector.shape_cast %59 : vector<1x1x16x128xf32> to vector<1x16x128xf32>
    %61 = vector.shape_cast %58 : vector<1x16x128xf32> to vector<1x1x16x128xf32>
    tpu.vector_store %arg7[%c0_19, %c0_20, %c0_21, %c0_22], %61 {strides = array<i32>} : memref<1x1x16x128xf32, #tpu.memory_space<vmem>>, vector<1x1x16x128xf32>,
    return
  }
  func.func @transform_0(%arg0: i32, %arg1: i32) -> (i32, i32, i32, i32) {
    %c0_i32 = arith.constant 0 : i32
    %c0_i32_0 = arith.constant 0 : i32
    %c0_i32_1 = arith.constant 0 : i32
    return %arg0, %arg1, %c0_i32, %c0_i32_0 : i32, i32, i32, i32
  }
  func.func @transform_1(%arg0: i32, %arg1: i32) -> (i32, i32, i32) {
    %c0_i32 = arith.constant 0 : i32
    %c0_i32_0 = arith.constant 0 : i32
    %c0_i32_1 = arith.constant 0 : i32
    %c0_i32_2 = arith.constant 0 : i32
    return %c0_i32, %c0_i32_0, %c0_i32_1 : i32, i32, i32
  }
  func.func @transform_2(%arg0: i32, %arg1: i32) -> (i32, i32) {
    %c0_i32 = arith.constant 0 : i32
    %c0_i32_0 = arith.constant 0 : i32
    %c0_i32_1 = arith.constant 0 : i32
    return %c0_i32, %c0_i32_0 : i32, i32
  }
  func.func @transform_3(%arg0: i32, %arg1: i32) -> (i32, i32) {
    %c0_i32 = arith.constant 0 : i32
    %c0_i32_0 = arith.constant 0 : i32
    %c0_i32_1 = arith.constant 0 : i32
    return %c0_i32, %c0_i32_0 : i32, i32
  }
  func.func @transform_4(%arg0: i32, %arg1: i32) -> (i32, i32) {
    %c0_i32 = arith.constant 0 : i32
    %c0_i32_0 = arith.constant 0 : i32
    %c0_i32_1 = arith.constant 0 : i32
    return %c0_i32, %c0_i32_0 : i32, i32
  }
  func.func @transform_5(%arg0: i32, %arg1: i32) -> (i32, i32, i32, i32) {
    %c0_i32 = arith.constant 0 : i32
    %c0_i32_0 = arith.constant 0 : i32
    %c0_i32_1 = arith.constant 0 : i32
    return %arg0, %arg1, %c0_i32, %c0_i32_0 : i32, i32, i32, i32
  }
}

</mosaic_0001>

<bundles_post_ra>
// kernel: tpu_custom_call.1
= control target key start
LH: loop header
LB: loop body
LE: loop exit
PB: predicated region body
PF: predicated region fallthrough
CT: control target
= control target key end

     0   :  { %s1317_s0 = inlined_call_operand.hbm [shape: f32[2,1,32,128], index: 0, kind: input, shape index: {}]   ;;  %s1318_s1 = inlined_call_operand.hbm [shape: f32[3,128,128], index: 1, kind: input, shape index: {}]   ;;  %s1319_s2 = inlined_call_operand.vmem [shape: f32[1,128], index: 2, kind: input, shape index: {}]   ;;  %s1320_s3 = inlined_call_operand.vmem [shape: f32[1,128], index: 3, kind: input, shape index: {}]   ;;  %s1321_s4 = inlined_call_operand.vmem [shape: f32[1,128], index: 4, kind: input, shape index: {}]   ;;  %s1322_s5 = inlined_call_operand.hbm [shape: f32[2,1,16,128], index: 5, kind: output, shape index: {}]  }
   0x1   :  { %1328 = sst [smem:[#allocation13_spill]] %s1318_s1 }
   0x2   :  { %10 = vsyncpa [#allocation3], 0 }
   0x3   :  { %12 = vsyncpa [#allocation3 + $0x1], 0 }
   0x4   :  { %13 = vsyncpa [#allocation6], 0 }
   0x5   :  { %14 = vsyncpa [#allocation4], 0 }
   0x6   :  { %16 = vsyncpa [#allocation4 + $0x1], 0  ;;  %s979_s18 = smov 0   ;;  %s981_s19 = smov 0  }
   0x7   :  { %s983_s20 = smov 0   ;;  %s985_s21 = smov 0  }
   0x8   :  { %s987_s22 = smov 0   ;;  %s989_s23 = smov 0  }
   0x9 LB: > { %1329 = sst [smem:[#allocation11_spill]] %s942_s23  ;;  %s665_s24 = sadd.s32 4294967295, %s942_s23   ;;  %s942_s23 = sphi %s989_s23, %s22_s23   ;;  %s938_s22 = sphi %s987_s22, %s1347_s22   ;;  %s934_s21 = sphi %s985_s21, %s1346_s21   ;;  %s930_s20 = sphi %s983_s20, %s1345_s20   ;;  %s926_s19 = sphi %s981_s19, %s1344_s19   ;;  %s922_s18 = sphi %s979_s18, %s1343_s18  }
   0xa   : > { %s666_s25 = sadd.s32 4294967294, %s942_s23   ;;  %p56_p0 = scmp.ne.s32.totalorder %s926_s19, %s922_s18 }
   0xb   : > { %p1013_p1 = scmp.eq.s32.totalorder %s665_s24, 0  ;;  %p1017_p2 = scmp.eq.s32.totalorder %s665_s24, 1 }
   0xc   : > { %p172_p3 = scmp.eq.s32.totalorder %s666_s25, 1  ;;  %p667_p5 = scmp.ge.s32.totalorder %s942_s23, 1 }
   0xd   : > { %p1023_p4 = por %p1013_p1, %p56_p0  ;;  %p179_p7 = scmp.lt.s32.totalorder %s942_s23, 3 }
   0xe   : > { %p1028_p6 = por %p172_p3, %p56_p0  ;;  %s1334_s1 = sld [smem:[#allocation13_spill]] }
   0xf   : > { %p1036_p8 = pnand %p667_p5, %p179_p7  ;;  %s944_s9 = smov [#allocation5]  }
  0x10   : > { %s192_s10 = sshll.u32 %s944_s9, 4  ;;  %p669_p11 = scmp.ge.s32.totalorder %s942_s23, 2  ;;  %s193_s10 = int_to_ptr.vmem [resolvable:$true] %s192_s10 }
  0x11   : > { %p724_p9 = pneg %p1036_p8  ;;  %s1323_s11 = smov 128  }
  0x12   : > { %s1324_s12 = smov 8   ;;  %s34_s13 = sadd.s32 1, %s938_s22 }
  0x13   : > { %p725_p10 = pnand %p724_p9, %p1013_p1  ;;  %p36_p12 = scmp.ge.s32.totalorder %s34_s13, 2 }
  0x14   : > { %s190_s7 = sshll.u32 %s1334_s1, 4  ;;  %s43_s14 = sadd.s32 1, %s930_s20  ;;  %s191_s7 = int_to_ptr.hbm [resolvable:$true] %s190_s7 }
  0x15   : > { %727 = dma.hbm_to_vmem [thread:$0]  (!%p725_p10), %s191_s7, 6144, %s193_s10, [#allocation6], %s1323_s11, %s1323_s11, %s1324_s12  }
  0x16   : > { %p50_p13 = scmp.ne.s32.totalorder %s930_s20, %s926_s19  ;;  %p51_p0 = scmp.eq.s32.totalorder %s942_s23, 0 }
  0x17   : > { %s1349_s13 = smov (%p36_p12, %s34_s13), 0  ;;  %p737_p7 = scmp.lt.s32.totalorder %s942_s23, 2 }
  0x18   : > { %1336 = sst [smem:[#allocation12_spill]] %s1349_s13  ;;  %p1055_p3 = por %p51_p0, %p50_p13 }
  0x19   : > { %p1061_p5 = por %p1017_p2, %p50_p13  ;;  %s38_s17 = ssub.s32 %s938_s22, %s1349_s13 }
  0x1a   : > { %p41_p9 = scmp.eq.s32.totalorder %s38_s17, 0  ;;  %s215_s24 = sand.u32 1, %s930_s20  }
  0x1b   : > { %s670_s25 = sshll.u32 %s215_s24, 5  ;;  %s682_s6 = sshll.u32 %s938_s22, 5 }
  0x1c   : > { %s1070_s30 = scalar_select %p41_p9, %s930_s20, %s43_s14  }
  0x1d   : > { %s226_s10 = scalar_lea.hbm %s1317_s0, %s682_s6  ;;  %s219_s11 = scalar_lea.vmem [#allocation2], %s670_s25 }
  0x1e   : > { %s229_s12 = sshll.u32 %s219_s11, 4  ;;  %s227_s27 = sshll.u32 %s226_s10, 4  ;;  %s230_s12 = int_to_ptr.vmem [resolvable:$true] %s229_s12  ;;  %s228_s27 = int_to_ptr.hbm [resolvable:$true] %s227_s27 }
  0x1f   : > { %p729_p2 = pnand %p737_p7, %p1055_p3  ;;  %s216_s1 = scalar_lea.sflag [#allocation3], %s215_s24 }
  0x20   : > { %s1339_s13 = smov 8   ;;  %s1340_s23 = smov 128  }
  0x21   : > { %731 = dma.hbm_to_vmem [thread:$0]  (!%p729_p2), %s228_s27, 512, %s230_s12, %s216_s1, %s1340_s23, %s1340_s23, %s1339_s13  }
  0x22   : > { %241 = sbr.rel (%p1036_p8) target bundleno = 386 (0x182), region = 40  ;;  %s1084_s14 = sand.u32 (!%p1036_p8), 1, %s926_s19  }
  0x23   : > { %s674_s11 = sshll.u32 (!%p1036_p8), %s1084_s14, 5  ;;  %s244_s17 = scalar_lea.sflag (!%p1036_p8), [#allocation3], %s1084_s14 }
  0x24   : > { %s1088_s25 = scalar_lea.vmem (!%p1036_p8), [#allocation2], %s674_s11 }
  0x27   : > { %909 = dma.done.wait (%p1023_p4), %s244_s17, 512  }
  0x28   : > { %911 = vsyncadd (%p1023_p4), %s244_s17, 4294966784 }
  0x29   : > { %913 = dma.done.wait (%p1013_p1), [#allocation6], 6144  }
  0x2a   : > { %915 = vsyncadd (%p1013_p1), [#allocation6], 4294961152  ;;  %v1098_v0 = vld [vmem:[#allocation5 + $0x178] sm:$0xff]  ;;  %v1100_v1 = vld [vmem:[#allocation5 + $0x170] sm:$0xff]  ;;  %vm396_vm0 = vcmask 1045504   ;;  %vm335_vm1 = vcmask 1046528  }
  0x2b   : > { %v314_v2 = vld [vmem:[#allocation5 + $0xf8] sm:$0xff]  ;;  %405 = vmatpush.msra.mxu2 %v1098_v0  ;;  %v313_v4 = vld [vmem:[#allocation5 + $0xf0] sm:$0xff]  ;;  %v1106_v5 = vld [vmem:[#allocation5 + $0x168] sm:$0xff]  ;;  %s676_s13 = sshll.u32 %s1084_s14, 4  ;;  %s683_s24 = sshll.u32 %s934_s21, 4 }
  0x2c   : > { %344 = vmatpush.msra.mxu0 %v314_v2  ;;  %v1103_v3 = vld [vmem:[#allocation5 + $0x78] sm:$0xff]  ;;  %v1108_v6 = vld [vmem:[#allocation5 + $0x70] sm:$0xff]  ;;  %v312_v7 = vld [vmem:[#allocation5 + $0xe8] sm:$0xff]  ;;  %450 = vmatpush.msra.mxu3 %v314_v2  ;;  %s279_s15 = scalar_lea.vmem [#allocation7], %s676_s13  ;;  %s564_s9 = scalar_lea.hbm %s1322_s5, %s683_s24 }
  0x2d   : > { %370 = vmatpush.msra.mxu1 %v1103_v3  ;;  %406 = vmatpush.msra.mxu2 %v1100_v1  ;;  %v1111_v8 = vld [vmem:[#allocation5 + $0x68] sm:$0xff]  ;;  %v1114_v9 = vld [vmem:[#allocation5 + $0x160] sm:$0xff]  ;;  %v1120_v12 = vld [vmem:[#allocation5 + $0x158] sm:$0xff]  ;;  %s565_s10 = sshll.u32 %s279_s15, 4  ;;  %s567_s27 = sshll.u32 %s564_s9, 4  ;;  %s566_s10 = int_to_ptr.vmem [resolvable:$true] %s565_s10  ;;  %s568_s27 = int_to_ptr.hbm [resolvable:$true] %s567_s27 }
  0x2e   : > { %345 = vmatpush.msra.mxu0 %v313_v4  ;;  %v311_v10 = vld [vmem:[#allocation5 + $0xe0] sm:$0xff]  ;;  %451 = vmatpush.msra.mxu3 %v313_v4  ;;  %v310_v13 = vld [vmem:[#allocation5 + $0xd8] sm:$0xff]  ;;  %v1126_v15 = vld [vmem:[#allocation5 + $0x150] sm:$0xff]  ;;  %s551_s11 = scalar_lea.sflag [#allocation4], %s1084_s14  ;;  %s870_s17 = sshra.s32 %s568_s27, 4  ;;  %s871_s17 = int_to_ptr.hbm [resolvable:$true] %s870_s17 }
  0x2f   : > { %371 = vmatpush.msra.mxu1 %v1108_v6  ;;  %407 = vmatpush.msra.mxu2 %v1106_v5  ;;  %v1117_v11 = vld [vmem:[#allocation5 + $0x60] sm:$0xff]  ;;  %v1123_v14 = vld [vmem:[#allocation5 + $0x58] sm:$0xff]  ;;  %v309_v16 = vld [vmem:[#allocation5 + $0xd0] sm:$0xff]  ;;  %s872_s21 = scalar_lea.hbm %s871_s17, 16  ;;  %s876_s23 = scalar_lea.hbm %s1322_s5, 32 }
  0x30   : > { %346 = vmatpush.msra.mxu0 %v312_v7  ;;  %452 = vmatpush.msra.mxu3 %v312_v7  ;;  %v1129_v17 = vld [vmem:[#allocation5 + $0x50] sm:$0xff]  ;;  %v1132_v18 = vld [vmem:[#allocation5 + $0x148] sm:$0xff]  ;;  %v1138_v21 = vld [vmem:[#allocation5 + $0x140] sm:$0xff]  ;;  %p873_p1 = scmp.ne.s32.totalorder %s871_s17, %s872_s21  ;;  %p877_p10 = scmp.lt.s32.totalorder %s871_s17, %s1322_s5 }
  0x31   : > { %372 = vmatpush.msra.mxu1 %v1111_v8  ;;  %408 = vmatpush.msra.mxu2 %v1114_v9  ;;  %v308_v19 = vld [vmem:[#allocation5 + $0xc8] sm:$0xff]  ;;  %v307_v22 = vld [vmem:[#allocation5 + $0xc0] sm:$0xff]  ;;  %v1144_v24 = vld [vmem:[#allocation5 + $0x138] sm:$0xff]  ;;  %p878_p12 = scmp.lt.s32.totalorder %s876_s23, %s872_s21 }
  0x32   : > { %347 = vmatpush.msra.mxu0 %v311_v10  ;;  %453 = vmatpush.msra.mxu3 %v311_v10  ;;  %v1135_v20 = vld [vmem:[#allocation5 + $0x48] sm:$0xff]  ;;  %v1141_v23 = vld [vmem:[#allocation5 + $0x40] sm:$0xff]  ;;  %v306_v25 = vld [vmem:[#allocation5 + $0xb8] sm:$0xff]  ;;  %p874_p4 = pnand %p873_p1, %p1061_p5 }
  0x33   : > { %373 = vmatpush.msra.mxu1 %v1117_v11  ;;  %409 = vmatpush.msra.mxu2 %v1120_v12  ;;  %v1147_v26 = vld [vmem:[#allocation5 + $0x38] sm:$0xff]  ;;  %v1150_v27 = vld [vmem:[#allocation5 + $0x130] sm:$0xff]  ;;  %v1156_v30 = vld [vmem:[#allocation5 + $0x128] sm:$0xff]  ;;  %p879_p13 = por %p878_p12, %p877_p10 }
  0x34   : > { %348 = vmatpush.msra.mxu0 %v310_v13  ;;  %454 = vmatpush.msra.mxu3 %v310_v13  ;;  %v305_v28 = vld [vmem:[#allocation5 + $0xb0] sm:$0xff]  ;;  %v304_v31 = vld [vmem:[#allocation5 + $0xa8] sm:$0xff]  ;;  %v1162_v33 = vld [vmem:[#allocation5 + $0x120] sm:$0xff]  ;;  %p875_p8 = pneg %p874_p4 }
  0x35   : > { %374 = vmatpush.msra.mxu1 %v1123_v14  ;;  %410 = vmatpush.msra.mxu2 %v1126_v15  ;;  %v1153_v29 = vld [vmem:[#allocation5 + $0x30] sm:$0xff]  ;;  %v1159_v32 = vld [vmem:[#allocation5 + $0x28] sm:$0xff]  ;;  %v303_v34 = vld [vmem:[#allocation5 + $0xa0] sm:$0xff] }
  0x36   : > { %349 = vmatpush.msra.mxu0 %v309_v16  ;;  %455 = vmatpush.msra.mxu3 %v309_v16  ;;  %v1165_v35 = vld [vmem:[#allocation5 + $0x118] sm:$0xff]  ;;  %v1167_v36 = vld [vmem:[#allocation5 + $0x20] sm:$0xff]  ;;  %v281_v39 = vld [vmem:[%s1088_s25 + $0x8] sm:$0xff]  ;;  %p880_p0 = pnand %p879_p13, %p875_p8 }
  0x37   : > { %375 = vmatpush.msra.mxu1 %v1129_v17  ;;  %411 = vmatpush.msra.mxu2 %v1132_v18  ;;  %v302_v37 = vld [vmem:[#allocation5 + $0x98] sm:$0xff]  ;;  %v280_v38 = vld [vmem:[%s1088_s25] sm:$0xff]  ;;  %v1176_v41 = vld [vmem:[#allocation5 + $0x110] sm:$0xff]  ;;  %v398_v45 = vrot.slane %v281_v39, 2  ;;  %v337_v49 = vrot.slane %v281_v39, 1 }
  0x38   : > { %350 = vmatpush.msra.mxu0 %v308_v19  ;;  %456 = vmatpush.msra.mxu3 %v308_v19  ;;  %v1173_v40 = vld [vmem:[#allocation5 + $0x18] sm:$0xff]  ;;  %v301_v42 = vld [vmem:[#allocation5 + $0x90] sm:$0xff]  ;;  %v397_v44 = vrot.slane %v280_v38, 2  ;;  %v1182_v46 = vld [vmem:[#allocation5 + $0x108] sm:$0xff]  ;;  %v336_v48 = vrot.slane %v280_v38, 1 }
  0x39   : > { %376 = vmatpush.msra.mxu1 %v1135_v20  ;;  %412 = vmatpush.msra.mxu2 %v1138_v21  ;;  %v1179_v43 = vld [vmem:[#allocation5 + $0x10] sm:$0xff]  ;;  %v300_v47 = vld [vmem:[#allocation5 + $0x88] sm:$0xff]  ;;  %v1188_v51 = vld [vmem:[#allocation5 + $0x100] sm:$0xff] }
  0x3a   : > { %351 = vmatpush.msra.mxu0 %v307_v22  ;;  %457 = vmatpush.msra.mxu3 %v307_v22  ;;  %v1185_v50 = vld [vmem:[#allocation5 + $0x8] sm:$0xff]  ;;  %v299_v52 = vld [vmem:[#allocation5 + $0x80] sm:$0xff]  ;;  %v399_v53 = vsel %vm396_vm0, %v397_v44, %v398_v45  ;;  %v338_v55 = vsel %vm335_vm1, %v336_v48, %v337_v49  ;;  %v282_v56 = vld [vmem:[%s1088_s25 + $0x10] sm:$0xff] }
  0x3b   : > { %377 = vmatpush.msra.mxu1 %v1141_v23  ;;  %413 = vmatpush.msra.mxu2 %v1144_v24  ;;  %v1192_v54 = vld [vmem:[#allocation5] sm:$0xff]  ;;  %v400_v57 = vrot.slane %v282_v56, 2  ;;  %v339_v58 = vrot.slane %v282_v56, 1 }
  0x3c   : > { %352 = vmatpush.msra.mxu0 %v306_v25  ;;  %458 = vmatpush.msra.mxu3 %v306_v25 }
  0x3d   : > { %378 = vmatpush.msra.mxu1 %v1147_v26  ;;  %414 = vmatpush.msra.mxu2 %v1150_v27  ;;  %v401_v59 = vsel %vm396_vm0, %v398_v45, %v400_v57  ;;  %v340_v60 = vsel %vm335_vm1, %v337_v49, %v339_v58 }
  0x3e   : > { %353 = vmatpush.msra.mxu0 %v305_v28  ;;  %459 = vmatpush.msra.mxu3 %v305_v28 }
  0x3f   : > { %379 = vmatpush.msra.mxu1 %v1153_v29  ;;  %415 = vmatpush.msra.mxu2 %v1156_v30 }
  0x40   : > { %354 = vmatpush.msra.mxu0 %v304_v31  ;;  %460 = vmatpush.msra.mxu3 %v304_v31 }
  0x41   : > { %380 = vmatpush.msra.mxu1 %v1159_v32  ;;  %416 = vmatpush.msra.mxu2 %v1162_v33 }
  0x42   : > { %355 = vmatpush.msra.mxu0 %v303_v34  ;;  %461 = vmatpush.msra.mxu3 %v303_v34  ;;  %v795_v34 = vld [vmem:[%s1321_s4] ss:$0 sm:$0xff] }
  0x43   : > { %381 = vmatpush.msra.mxu1 %v1167_v36  ;;  %417 = vmatpush.msra.mxu2 %v1165_v35 }
  0x44   : > { %356 = vmatpush.msra.mxu0 %v302_v37  ;;  %462 = vmatpush.msra.mxu3 %v302_v37 }
  0x45   : > { %382 = vmatpush.msra.mxu1 %v1173_v40  ;;  %418 = vmatpush.msra.mxu2 %v1176_v41 }
  0x46   : > { %357 = vmatpush.msra.mxu0 %v301_v42  ;;  %463 = vmatpush.msra.mxu3 %v301_v42 }
  0x47   : > { %383 = vmatpush.msra.mxu1 %v1179_v43  ;;  %419 = vmatpush.msra.mxu2 %v1182_v46 }
  0x48   : > { %358 = vmatpush.msra.mxu0 %v300_v47  ;;  %464 = vmatpush.msra.mxu3 %v300_v47 }
  0x49   : > { %384 = vmatpush.msra.mxu1 %v1185_v50  ;;  %420 = vmatpush.msra.mxu2 %v1188_v51 }
  0x4a   : > { %359 = vmatpush.msra.mxu0 %v299_v52  ;;  %421 = vmatmul.f32.vlgmr.msra.gmra.mxu2 %v399_v53 }
  0x4b   : > { %385 = vmatpush.msra.mxu1 %v1192_v54  ;;  %360 = vmatmul.f32.vlgmr.msra.gmra.mxu0 %v338_v55 }
  0x4c   : > { %386 = vmatmul.f32.vlgmr.msra.gmra.mxu1 %v280_v38  ;;  %473 = vmatpush.msrb.mxu0 %v1103_v3 }
  0x4d   : > { %503 = vmatpush.msrb.mxu1 %v1098_v0  ;;  %700 = vmatpush.msrb.mxu2 %v1098_v0  ;;  %v793_v0 = vld [vmem:[%s1319_s2] ss:$0 sm:$0xff] }
  0x4e   : > { %465 = vmatpush.msra.mxu3 %v299_v52  ;;  %474 = vmatpush.msrb.mxu0 %v1108_v6 }
  0x4f   : > { %504 = vmatpush.msrb.mxu1 %v1100_v1  ;;  %701 = vmatpush.msrb.mxu2 %v1100_v1 }
  0x50   : > { %684 = vmatpush.msrb.mxu3 %v1103_v3  ;;  %475 = vmatpush.msrb.mxu0 %v1111_v8 }
  0x51   : > { %505 = vmatpush.msrb.mxu1 %v1106_v5  ;;  %702 = vmatpush.msrb.mxu2 %v1106_v5 }
  0x52   : > { %685 = vmatpush.msrb.mxu3 %v1108_v6  ;;  %424 = vmatmul.f32.gmra.mxu2 %v401_v59 }
  0x53   : > { %476 = vmatpush.msrb.mxu0 %v1117_v11  ;;  %506 = vmatpush.msrb.mxu1 %v1114_v9 }
  0x54   : > { %363 = vmatmul.f32.gmra.mxu0 %v340_v60  ;;  %389 = vmatmul.f32.gmra.mxu1 %v281_v39 }
  0x55   : > { %477 = vmatpush.msrb.mxu0 %v1123_v14  ;;  %703 = vmatpush.msrb.mxu2 %v1114_v9 }
  0x56   : > { %686 = vmatpush.msrb.mxu3 %v1111_v8  ;;  %507 = vmatpush.msrb.mxu1 %v1120_v12 }
  0x57   : > { %478 = vmatpush.msrb.mxu0 %v1129_v17  ;;  %704 = vmatpush.msrb.mxu2 %v1120_v12 }
  0x58   : > { %687 = vmatpush.msrb.mxu3 %v1117_v11  ;;  %508 = vmatpush.msrb.mxu1 %v1126_v15 }
  0x59   : > { %479 = vmatpush.msrb.mxu0 %v1135_v20  ;;  %705 = vmatpush.msrb.mxu2 %v1126_v15 }
  0x5a   : > { %688 = vmatpush.msrb.mxu3 %v1123_v14  ;;  %427 = vmatmul.f32.gmra.mxu2 %v400_v57 }
  0x5b   : > { %480 = vmatpush.msrb.mxu0 %v1141_v23  ;;  %509 = vmatpush.msrb.mxu1 %v1132_v18 }
  0x5c   : > { %366 = vmatmul.f32.gmra.mxu0 %v339_v58  ;;  %392 = vmatmul.f32.gmra.mxu1 %v282_v56 }
  0x5d   : > { %481 = vmatpush.msrb.mxu0 %v1147_v26  ;;  %706 = vmatpush.msrb.mxu2 %v1132_v18 }
  0x5e   : > { %689 = vmatpush.msrb.mxu3 %v1129_v17  ;;  %510 = vmatpush.msrb.mxu1 %v1138_v21 }
  0x5f   : > { %482 = vmatpush.msrb.mxu0 %v1153_v29  ;;  %707 = vmatpush.msrb.mxu2 %v1138_v21 }
  0x60   : > { %690 = vmatpush.msrb.mxu3 %v1135_v20  ;;  %511 = vmatpush.msrb.mxu1 %v1144_v24 }
  0x61   : > { %483 = vmatpush.msrb.mxu0 %v1159_v32  ;;  %708 = vmatpush.msrb.mxu2 %v1144_v24 }
  0x62   : > { %691 = vmatpush.msrb.mxu3 %v1141_v23  ;;  %512 = vmatpush.msrb.mxu1 %v1150_v27 }
  0x63   : > { %484 = vmatpush.msrb.mxu0 %v1167_v36  ;;  %709 = vmatpush.msrb.mxu2 %v1150_v27 }
  0x64   : > { %692 = vmatpush.msrb.mxu3 %v1147_v26  ;;  %513 = vmatpush.msrb.mxu1 %v1156_v30 }
  0x65   : > { %485 = vmatpush.msrb.mxu0 %v1173_v40  ;;  %710 = vmatpush.msrb.mxu2 %v1156_v30 }
  0x66   : > { %693 = vmatpush.msrb.mxu3 %v1153_v29  ;;  %514 = vmatpush.msrb.mxu1 %v1162_v33 }
  0x67   : > { %486 = vmatpush.msrb.mxu0 %v1179_v43  ;;  %711 = vmatpush.msrb.mxu2 %v1162_v33 }
  0x68   : > { %694 = vmatpush.msrb.mxu3 %v1159_v32  ;;  %515 = vmatpush.msrb.mxu1 %v1165_v35  ;;  %v794_v32 = vld [vmem:[%s1320_s3] ss:$0 sm:$0xff] }
  0x69   : > { %487 = vmatpush.msrb.mxu0 %v1185_v50  ;;  %712 = vmatpush.msrb.mxu2 %v1165_v35 }
  0x6a   : > { %695 = vmatpush.msrb.mxu3 %v1167_v36  ;;  %516 = vmatpush.msrb.mxu1 %v1176_v41 }
  0x6b   : > { %488 = vmatpush.msrb.mxu0 %v1192_v54  ;;  %713 = vmatpush.msrb.mxu2 %v1176_v41 }
  0x6c   : > { %696 = vmatpush.msrb.mxu3 %v1173_v40  ;;  %517 = vmatpush.msrb.mxu1 %v1182_v46 }
  0x6d   : > { %714 = vmatpush.msrb.mxu2 %v1182_v46 }
  0x6e   : > { %697 = vmatpush.msrb.mxu3 %v1179_v43  ;;  %518 = vmatpush.msrb.mxu1 %v1188_v51 }
  0x6f   : > { %715 = vmatpush.msrb.mxu2 %v1188_v51 }
  0x70   : > { %698 = vmatpush.msrb.mxu3 %v1185_v50 }
  0x72   : > { %699 = vmatpush.msrb.mxu3 %v1192_v54 }
  0xc8   : > { %v361_v61 = vpop.f32.mrf.mxu0 }
  0xc9   : > { %v387_v62 = vpop.f32.mrf.mxu1 }
  0xca   : > { %v388_v63 = vadd.f32 %v387_v62, %v361_v61 }
  0xcd   : > { %v422_v1 = vpop.f32.mrf.mxu2 }
  0xce   : > { %v431_v2 = vadd.f32 %v422_v1, %v388_v63 }
  0xd0   : > { %v437_v3 = vadd.f32 %v793_v0, %v431_v2 }
  0xd1   : > { %v364_v4 = vpop.f32.mrf.mxu0  ;;  %v390_v5 = vpop.f32.mrf.mxu1 }
  0xd2   : > { %489 = vmatmul.f32.vlgmr.msrb.gmra.mxu0 %v437_v3  ;;  %v391_v6 = vadd.f32 %v390_v5, %v364_v4  ;;  %v443_v12 = vrot.slane %v437_v3, 1  ;;  %v496_v15 = vrot.slane %v437_v3, 2 }
  0xd5   : > { %v425_v7 = vpop.f32.mrf.mxu2 }
  0xd6   : > { %v432_v8 = vadd.f32 %v425_v7, %v391_v6 }
  0xd8   : > { %v438_v9 = vadd.f32 %v793_v0, %v432_v8 }
  0xd9   : > { %v367_v10 = vpop.f32.mrf.mxu0  ;;  %v393_v11 = vpop.f32.mrf.mxu1 }
  0xda   : > { %v394_v13 = vadd.f32 %v393_v11, %v367_v10  ;;  %v444_v14 = vrot.slane %v438_v9, 1  ;;  %v497_v16 = vrot.slane %v438_v9, 2 }
  0xdc   : > { %v445_v17 = vsel %vm335_vm1, %v443_v12, %v444_v14  ;;  %v498_v18 = vsel %vm396_vm0, %v496_v15, %v497_v16 }
  0xdd   : > { %v428_v19 = vpop.f32.mrf.mxu2  ;;  %466 = vmatmul.f32.vlgmr.msra.gmra.mxu3 %v445_v17  ;;  %519 = vmatmul.f32.vlgmr.msrb.gmra.mxu1 %v498_v18 }
  0xde   : > { %v433_v20 = vadd.f32 %v428_v19, %v394_v13 }
  0xe0   : > { %v439_v21 = vadd.f32 %v793_v0, %v433_v20 }
  0xe2   : > { %v446_v22 = vrot.slane %v439_v21, 1  ;;  %v499_v23 = vrot.slane %v439_v21, 2 }
  0xe4   : > { %v447_v24 = vsel %vm335_vm1, %v444_v14, %v446_v22  ;;  %v500_v25 = vsel %vm396_vm0, %v497_v16, %v499_v23 }
  0xe5   : > { %469 = vmatmul.f32.gmra.mxu3 %v447_v24  ;;  %522 = vmatmul.f32.vlgmr.msrb.gmra.mxu2 %v500_v25 }
  0xed   : > { %492 = vmatmul.f32.vlgmr.msrb.gmra.mxu3 %v438_v9 }
 0x14f   : > { %v490_v26 = vpop.f32.mrf.mxu0 }
 0x15a   : > { %v520_v29 = vpop.f32.mrf.mxu1 }
 0x160   : > { %v467_v27 = vpop.f32.mrf.mxu3 }
 0x161   : > { %v491_v28 = vadd.f32 %v490_v26, %v467_v27 }
 0x163   : > { %v526_v30 = vadd.f32 %v520_v29, %v491_v28 }
 0x165   : > { %v528_v31 = vadd.f32 %v793_v0, %v526_v30 }
 0x167   : > { %vm530_vm2 = vcmp.gt.f32.partialorder %v528_v31, 0.0  ;;  %v532_v33 = vmul.f32 0.01, %v528_v31 }
 0x168   : > { %v470_v35 = vpop.f32.mrf.mxu3  ;;  %v523_v41 = vpop.f32.mrf.mxu2 }
 0x169   : > { %v534_v36 = vsel %vm530_vm2, %v528_v31, %v532_v33 }
 0x16a   : > { %v540_v37 = vmul.f32 %v794_v32, %v534_v36 }
 0x16c   : > { %v546_v38 = vadd.f32 %v795_v34, %v540_v37 }
 0x16e   : > { %548 = vst [vmem:[%s279_s15] sm:$0xff] %v546_v38 }
 0x170   : > { %v493_v39 = vpop.f32.mrf.mxu3 }
 0x171   : > { %v494_v40 = vadd.f32 %v493_v39, %v470_v35 }
 0x173   : > { %v527_v42 = vadd.f32 %v523_v41, %v494_v40 }
 0x175   : > { %v529_v43 = vadd.f32 %v793_v0, %v527_v42 }
 0x177   : > { %vm531_vm3 = vcmp.gt.f32.partialorder %v529_v43, 0.0  ;;  %v533_v44 = vmul.f32 0.01, %v529_v43 }
 0x179   : > { %v535_v45 = vsel %vm531_vm3, %v529_v43, %v533_v44 }
 0x17a   : > { %v541_v46 = vmul.f32 %v794_v32, %v535_v45 }
 0x17c   : > { %v547_v47 = vadd.f32 %v795_v34, %v541_v46 }
 0x17e   : > { %549 = vst [vmem:[%s279_s15 + $0x8] sm:$0xff] %v547_v47 }
 0x17f   : > { %883 = shalt.err (!%p880_p0)
}
 0x180   : > { %s947_s14 = smov 128   ;;  %s948_s8 = smov 8  }
 0x181   : > { %722 = dma.vmem_to_hbm [thread:$0]  (%p1061_p5), %s566_s10, 256, %s568_s27, %s551_s11, %s947_s14, %s947_s14, %s948_s8  }
 0x182 PF: > { %s1341_s12 = sld [smem:[#allocation11_spill]]  ;;  %s582_s13 = sand.u32 1, %s922_s18  }
 0x183   : > { %p733_p3 = pnand %p669_p11, %p1028_p6  ;;  %s583_s15 = scalar_lea.sflag [#allocation4], %s582_s13 }
 0x185   : > { %p734_p7 = pneg %p733_p3 }
 0x187   : > { %917 = dma.done.wait (%p734_p7), %s583_s15, 256  }
 0x188   : > { %919 = vsyncadd (%p734_p7), %s583_s15, 4294967040  ;;  %s22_s23 = sadd.s32 1, %s1341_s12   ;;  %s1342_s16 = sld [smem:[#allocation12_spill]] }
 0x189   : > { %p19_p9 = scmp.ge.s32.totalorder %s22_s23, 4   ;;  %s1343_s18 = smov %s926_s19 }
 0x18a   : > { %s1344_s19 = smov %s930_s20  ;;  %s1345_s20 = smov %s1070_s30 }
 0x18b   : > { %s1346_s21 = smov %s938_s22  ;;  %21 = sbr.rel (!%p19_p9) target bundleno = 9 (0x9), region = 89 }
 0x18e   : > { %s1347_s22 = smov %s1342_s16 }
 0x190   :  { %589 = vsyncpa [#allocation3], 1 }
 0x191   :  { %591 = vsyncpa [#allocation3 + $0x1], 1 }
 0x192   :  { %592 = vsyncpa [#allocation6], 1 }
 0x193   :  { %593 = vsyncpa [#allocation4], 1 }
 0x194   :  { %595 = vsyncpa [#allocation4 + $0x1], 1 }

// kernel: tpu_custom_call.1
= control target key start
LH: loop header
LB: loop body
LE: loop exit
PB: predicated region body
PF: predicated region fallthrough
CT: control target
= control target key end

     0   :  { %s1317_s0 = inlined_call_operand.hbm [shape: f32[2,1,32,128], index: 0, kind: input, shape index: {}]   ;;  %s1318_s1 = inlined_call_operand.hbm [shape: f32[3,128,128], index: 1, kind: input, shape index: {}]   ;;  %s1319_s2 = inlined_call_operand.vmem [shape: f32[1,128], index: 2, kind: input, shape index: {}]   ;;  %s1320_s3 = inlined_call_operand.vmem [shape: f32[1,128], index: 3, kind: input, shape index: {}]   ;;  %s1321_s4 = inlined_call_operand.vmem [shape: f32[1,128], index: 4, kind: input, shape index: {}]   ;;  %s1322_s5 = inlined_call_operand.hbm [shape: f32[2,1,16,128], index: 5, kind: output, shape index: {}]  }
   0x1   :  { %1328 = sst [smem:[#allocation13_spill]] %s1318_s1 }
   0x2   :  { %10 = vsyncpa [#allocation3], 0 }
   0x3   :  { %12 = vsyncpa [#allocation3 + $0x1], 0 }
   0x4   :  { %13 = vsyncpa [#allocation6], 0 }
   0x5   :  { %14 = vsyncpa [#allocation4], 0 }
   0x6   :  { %16 = vsyncpa [#allocation4 + $0x1], 0  ;;  %s979_s18 = smov 0   ;;  %s981_s19 = smov 0  }
   0x7   :  { %s983_s20 = smov 0   ;;  %s985_s21 = smov 0  }
   0x8   :  { %s987_s22 = smov 0   ;;  %s989_s23 = smov 0  }
   0x9 LB: > { %1329 = sst [smem:[#allocation11_spill]] %s942_s23  ;;  %s665_s24 = sadd.s32 4294967295, %s942_s23   ;;  %s942_s23 = sphi %s989_s23, %s22_s23   ;;  %s938_s22 = sphi %s987_s22, %s1347_s22   ;;  %s934_s21 = sphi %s985_s21, %s1346_s21   ;;  %s930_s20 = sphi %s983_s20, %s1345_s20   ;;  %s926_s19 = sphi %s981_s19, %s1344_s19   ;;  %s922_s18 = sphi %s979_s18, %s1343_s18  }
   0xa   : > { %s666_s25 = sadd.s32 4294967294, %s942_s23   ;;  %p56_p0 = scmp.ne.s32.totalorder %s926_s19, %s922_s18 }
   0xb   : > { %p1013_p1 = scmp.eq.s32.totalorder %s665_s24, 0  ;;  %p1017_p2 = scmp.eq.s32.totalorder %s665_s24, 1 }
   0xc   : > { %p172_p3 = scmp.eq.s32.totalorder %s666_s25, 1  ;;  %p667_p5 = scmp.ge.s32.totalorder %s942_s23, 1 }
   0xd   : > { %p1023_p4 = por %p1013_p1, %p56_p0  ;;  %p179_p7 = scmp.lt.s32.totalorder %s942_s23, 3 }
   0xe   : > { %p1028_p6 = por %p172_p3, %p56_p0  ;;  %s1334_s1 = sld [smem:[#allocation13_spill]] }
   0xf   : > { %p1036_p8 = pnand %p667_p5, %p179_p7  ;;  %s944_s9 = smov [#allocation5]  }
  0x10   : > { %s192_s10 = sshll.u32 %s944_s9, 4  ;;  %p669_p11 = scmp.ge.s32.totalorder %s942_s23, 2  ;;  %s193_s10 = int_to_ptr.vmem [resolvable:$true] %s192_s10 }
  0x11   : > { %p724_p9 = pneg %p1036_p8  ;;  %s1323_s11 = smov 128  }
  0x12   : > { %s1324_s12 = smov 8   ;;  %s34_s13 = sadd.s32 1, %s938_s22 }
  0x13   : > { %p725_p10 = pnand %p724_p9, %p1013_p1  ;;  %p36_p12 = scmp.ge.s32.totalorder %s34_s13, 2 }
  0x14   : > { %s190_s7 = sshll.u32 %s1334_s1, 4  ;;  %s43_s14 = sadd.s32 1, %s930_s20  ;;  %s191_s7 = int_to_ptr.hbm [resolvable:$true] %s190_s7 }
  0x15   : > { %727 = dma.hbm_to_vmem [thread:$0]  (!%p725_p10), %s191_s7, 6144, %s193_s10, [#allocation6], %s1323_s11, %s1323_s11, %s1324_s12  }
  0x16   : > { %p50_p13 = scmp.ne.s32.totalorder %s930_s20, %s926_s19  ;;  %p51_p0 = scmp.eq.s32.totalorder %s942_s23, 0 }
  0x17   : > { %s1349_s13 = smov (%p36_p12, %s34_s13), 0  ;;  %p737_p7 = scmp.lt.s32.totalorder %s942_s23, 2 }
  0x18   : > { %1336 = sst [smem:[#allocation12_spill]] %s1349_s13  ;;  %p1055_p3 = por %p51_p0, %p50_p13 }
  0x19   : > { %p1061_p5 = por %p1017_p2, %p50_p13  ;;  %s38_s17 = ssub.s32 %s938_s22, %s1349_s13 }
  0x1a   : > { %p41_p9 = scmp.eq.s32.totalorder %s38_s17, 0  ;;  %s215_s24 = sand.u32 1, %s930_s20  }
  0x1b   : > { %s670_s25 = sshll.u32 %s215_s24, 5  ;;  %s682_s6 = sshll.u32 %s938_s22, 5 }
  0x1c   : > { %s1070_s30 = scalar_select %p41_p9, %s930_s20, %s43_s14  }
  0x1d   : > { %s226_s10 = scalar_lea.hbm %s1317_s0, %s682_s6  ;;  %s219_s11 = scalar_lea.vmem [#allocation2], %s670_s25 }
  0x1e   : > { %s229_s12 = sshll.u32 %s219_s11, 4  ;;  %s227_s27 = sshll.u32 %s226_s10, 4  ;;  %s230_s12 = int_to_ptr.vmem [resolvable:$true] %s229_s12  ;;  %s228_s27 = int_to_ptr.hbm [resolvable:$true] %s227_s27 }
  0x1f   : > { %p729_p2 = pnand %p737_p7, %p1055_p3  ;;  %s216_s1 = scalar_lea.sflag [#allocation3], %s215_s24 }
  0x20   : > { %s1339_s13 = smov 8   ;;  %s1340_s23 = smov 128  }
  0x21   : > { %731 = dma.hbm_to_vmem [thread:$0]  (!%p729_p2), %s228_s27, 512, %s230_s12, %s216_s1, %s1340_s23, %s1340_s23, %s1339_s13  }
  0x22   : > { %241 = sbr.rel (%p1036_p8) target bundleno = 386 (0x182), region = 40  ;;  %s1084_s14 = sand.u32 (!%p1036_p8), 1, %s926_s19  }
  0x23   : > { %s674_s11 = sshll.u32 (!%p1036_p8), %s1084_s14, 5  ;;  %s244_s17 = scalar_lea.sflag (!%p1036_p8), [#allocation3], %s1084_s14 }
  0x24   : > { %s1088_s25 = scalar_lea.vmem (!%p1036_p8), [#allocation2], %s674_s11 }
  0x27   : > { %909 = dma.done.wait (%p1023_p4), %s244_s17, 512  }
  0x28   : > { %911 = vsyncadd (%p1023_p4), %s244_s17, 4294966784 }
  0x29   : > { %913 = dma.done.wait (%p1013_p1), [#allocation6], 6144  }
  0x2a   : > { %915 = vsyncadd (%p1013_p1), [#allocation6], 4294961152  ;;  %v1098_v0 = vld [vmem:[#allocation5 + $0x178] sm:$0xff]  ;;  %v1100_v1 = vld [vmem:[#allocation5 + $0x170] sm:$0xff]  ;;  %vm396_vm0 = vcmask 1045504   ;;  %vm335_vm1 = vcmask 1046528  }
  0x2b   : > { %v314_v2 = vld [vmem:[#allocation5 + $0xf8] sm:$0xff]  ;;  %405 = vmatpush.msra.mxu2 %v1098_v0  ;;  %v313_v4 = vld [vmem:[#allocation5 + $0xf0] sm:$0xff]  ;;  %v1106_v5 = vld [vmem:[#allocation5 + $0x168] sm:$0xff]  ;;  %s676_s13 = sshll.u32 %s1084_s14, 4  ;;  %s683_s24 = sshll.u32 %s934_s21, 4 }
  0x2c   : > { %344 = vmatpush.msra.mxu0 %v314_v2  ;;  %v1103_v3 = vld [vmem:[#allocation5 + $0x78] sm:$0xff]  ;;  %v1108_v6 = vld [vmem:[#allocation5 + $0x70] sm:$0xff]  ;;  %v312_v7 = vld [vmem:[#allocation5 + $0xe8] sm:$0xff]  ;;  %450 = vmatpush.msra.mxu3 %v314_v2  ;;  %s279_s15 = scalar_lea.vmem [#allocation7], %s676_s13  ;;  %s564_s9 = scalar_lea.hbm %s1322_s5, %s683_s24 }
  0x2d   : > { %370 = vmatpush.msra.mxu1 %v1103_v3  ;;  %406 = vmatpush.msra.mxu2 %v1100_v1  ;;  %v1111_v8 = vld [vmem:[#allocation5 + $0x68] sm:$0xff]  ;;  %v1114_v9 = vld [vmem:[#allocation5 + $0x160] sm:$0xff]  ;;  %v1120_v12 = vld [vmem:[#allocation5 + $0x158] sm:$0xff]  ;;  %s565_s10 = sshll.u32 %s279_s15, 4  ;;  %s567_s27 = sshll.u32 %s564_s9, 4  ;;  %s566_s10 = int_to_ptr.vmem [resolvable:$true] %s565_s10  ;;  %s568_s27 = int_to_ptr.hbm [resolvable:$true] %s567_s27 }
  0x2e   : > { %345 = vmatpush.msra.mxu0 %v313_v4  ;;  %v311_v10 = vld [vmem:[#allocation5 + $0xe0] sm:$0xff]  ;;  %451 = vmatpush.msra.mxu3 %v313_v4  ;;  %v310_v13 = vld [vmem:[#allocation5 + $0xd8] sm:$0xff]  ;;  %v1126_v15 = vld [vmem:[#allocation5 + $0x150] sm:$0xff]  ;;  %s551_s11 = scalar_lea.sflag [#allocation4], %s1084_s14  ;;  %s870_s17 = sshra.s32 %s568_s27, 4  ;;  %s871_s17 = int_to_ptr.hbm [resolvable:$true] %s870_s17 }
  0x2f   : > { %371 = vmatpush.msra.mxu1 %v1108_v6  ;;  %407 = vmatpush.msra.mxu2 %v1106_v5  ;;  %v1117_v11 = vld [vmem:[#allocation5 + $0x60] sm:$0xff]  ;;  %v1123_v14 = vld [vmem:[#allocation5 + $0x58] sm:$0xff]  ;;  %v309_v16 = vld [vmem:[#allocation5 + $0xd0] sm:$0xff]  ;;  %s872_s21 = scalar_lea.hbm %s871_s17, 16  ;;  %s876_s23 = scalar_lea.hbm %s1322_s5, 32 }
  0x30   : > { %346 = vmatpush.msra.mxu0 %v312_v7  ;;  %452 = vmatpush.msra.mxu3 %v312_v7  ;;  %v1129_v17 = vld [vmem:[#allocation5 + $0x50] sm:$0xff]  ;;  %v1132_v18 = vld [vmem:[#allocation5 + $0x148] sm:$0xff]  ;;  %v1138_v21 = vld [vmem:[#allocation5 + $0x140] sm:$0xff]  ;;  %p873_p1 = scmp.ne.s32.totalorder %s871_s17, %s872_s21  ;;  %p877_p10 = scmp.lt.s32.totalorder %s871_s17, %s1322_s5 }
  0x31   : > { %372 = vmatpush.msra.mxu1 %v1111_v8  ;;  %408 = vmatpush.msra.mxu2 %v1114_v9  ;;  %v308_v19 = vld [vmem:[#allocation5 + $0xc8] sm:$0xff]  ;;  %v307_v22 = vld [vmem:[#allocation5 + $0xc0] sm:$0xff]  ;;  %v1144_v24 = vld [vmem:[#allocation5 + $0x138] sm:$0xff]  ;;  %p878_p12 = scmp.lt.s32.totalorder %s876_s23, %s872_s21 }
  0x32   : > { %347 = vmatpush.msra.mxu0 %v311_v10  ;;  %453 = vmatpush.msra.mxu3 %v311_v10  ;;  %v1135_v20 = vld [vmem:[#allocation5 + $0x48] sm:$0xff]  ;;  %v1141_v23 = vld [vmem:[#allocation5 + $0x40] sm:$0xff]  ;;  %v306_v25 = vld [vmem:[#allocation5 + $0xb8] sm:$0xff]  ;;  %p874_p4 = pnand %p873_p1, %p1061_p5 }
  0x33   : > { %373 = vmatpush.msra.mxu1 %v1117_v11  ;;  %409 = vmatpush.msra.mxu2 %v1120_v12  ;;  %v1147_v26 = vld [vmem:[#allocation5 + $0x38] sm:$0xff]  ;;  %v1150_v27 = vld [vmem:[#allocation5 + $0x130] sm:$0xff]  ;;  %v1156_v30 = vld [vmem:[#allocation5 + $0x128] sm:$0xff]  ;;  %p879_p13 = por %p878_p12, %p877_p10 }
  0x34   : > { %348 = vmatpush.msra.mxu0 %v310_v13  ;;  %454 = vmatpush.msra.mxu3 %v310_v13  ;;  %v305_v28 = vld [vmem:[#allocation5 + $0xb0] sm:$0xff]  ;;  %v304_v31 = vld [vmem:[#allocation5 + $0xa8] sm:$0xff]  ;;  %v1162_v33 = vld [vmem:[#allocation5 + $0x120] sm:$0xff]  ;;  %p875_p8 = pneg %p874_p4 }
  0x35   : > { %374 = vmatpush.msra.mxu1 %v1123_v14  ;;  %410 = vmatpush.msra.mxu2 %v1126_v15  ;;  %v1153_v29 = vld [vmem:[#allocation5 + $0x30] sm:$0xff]  ;;  %v1159_v32 = vld [vmem:[#allocation5 + $0x28] sm:$0xff]  ;;  %v303_v34 = vld [vmem:[#allocation5 + $0xa0] sm:$0xff] }
  0x36   : > { %349 = vmatpush.msra.mxu0 %v309_v16  ;;  %455 = vmatpush.msra.mxu3 %v309_v16  ;;  %v1165_v35 = vld [vmem:[#allocation5 + $0x118] sm:$0xff]  ;;  %v1167_v36 = vld [vmem:[#allocation5 + $0x20] sm:$0xff]  ;;  %v281_v39 = vld [vmem:[%s1088_s25 + $0x8] sm:$0xff]  ;;  %p880_p0 = pnand %p879_p13, %p875_p8 }
  0x37   : > { %375 = vmatpush.msra.mxu1 %v1129_v17  ;;  %411 = vmatpush.msra.mxu2 %v1132_v18  ;;  %v302_v37 = vld [vmem:[#allocation5 + $0x98] sm:$0xff]  ;;  %v280_v38 = vld [vmem:[%s1088_s25] sm:$0xff]  ;;  %v1176_v41 = vld [vmem:[#allocation5 + $0x110] sm:$0xff]  ;;  %v398_v45 = vrot.slane %v281_v39, 2  ;;  %v337_v49 = vrot.slane %v281_v39, 1 }
  0x38   : > { %350 = vmatpush.msra.mxu0 %v308_v19  ;;  %456 = vmatpush.msra.mxu3 %v308_v19  ;;  %v1173_v40 = vld [vmem:[#allocation5 + $0x18] sm:$0xff]  ;;  %v301_v42 = vld [vmem:[#allocation5 + $0x90] sm:$0xff]  ;;  %v397_v44 = vrot.slane %v280_v38, 2  ;;  %v1182_v46 = vld [vmem:[#allocation5 + $0x108] sm:$0xff]  ;;  %v336_v48 = vrot.slane %v280_v38, 1 }
  0x39   : > { %376 = vmatpush.msra.mxu1 %v1135_v20  ;;  %412 = vmatpush.msra.mxu2 %v1138_v21  ;;  %v1179_v43 = vld [vmem:[#allocation5 + $0x10] sm:$0xff]  ;;  %v300_v47 = vld [vmem:[#allocation5 + $0x88] sm:$0xff]  ;;  %v1188_v51 = vld [vmem:[#allocation5 + $0x100] sm:$0xff] }
  0x3a   : > { %351 = vmatpush.msra.mxu0 %v307_v22  ;;  %457 = vmatpush.msra.mxu3 %v307_v22  ;;  %v1185_v50 = vld [vmem:[#allocation5 + $0x8] sm:$0xff]  ;;  %v299_v52 = vld [vmem:[#allocation5 + $0x80] sm:$0xff]  ;;  %v399_v53 = vsel %vm396_vm0, %v397_v44, %v398_v45  ;;  %v338_v55 = vsel %vm335_vm1, %v336_v48, %v337_v49  ;;  %v282_v56 = vld [vmem:[%s1088_s25 + $0x10] sm:$0xff] }
  0x3b   : > { %377 = vmatpush.msra.mxu1 %v1141_v23  ;;  %413 = vmatpush.msra.mxu2 %v1144_v24  ;;  %v1192_v54 = vld [vmem:[#allocation5] sm:$0xff]  ;;  %v400_v57 = vrot.slane %v282_v56, 2  ;;  %v339_v58 = vrot.slane %v282_v56, 1 }
  0x3c   : > { %352 = vmatpush.msra.mxu0 %v306_v25  ;;  %458 = vmatpush.msra.mxu3 %v306_v25 }
  0x3d   : > { %378 = vmatpush.msra.mxu1 %v1147_v26  ;;  %414 = vmatpush.msra.mxu2 %v1150_v27  ;;  %v401_v59 = vsel %vm396_vm0, %v398_v45, %v400_v57  ;;  %v340_v60 = vsel %vm335_vm1, %v337_v49, %v339_v58 }
  0x3e   : > { %353 = vmatpush.msra.mxu0 %v305_v28  ;;  %459 = vmatpush.msra.mxu3 %v305_v28 }
  0x3f   : > { %379 = vmatpush.msra.mxu1 %v1153_v29  ;;  %415 = vmatpush.msra.mxu2 %v1156_v30 }
  0x40   : > { %354 = vmatpush.msra.mxu0 %v304_v31  ;;  %460 = vmatpush.msra.mxu3 %v304_v31 }
  0x41   : > { %380 = vmatpush.msra.mxu1 %v1159_v32  ;;  %416 = vmatpush.msra.mxu2 %v1162_v33 }
  0x42   : > { %355 = vmatpush.msra.mxu0 %v303_v34  ;;  %461 = vmatpush.msra.mxu3 %v303_v34  ;;  %v795_v34 = vld [vmem:[%s1321_s4] ss:$0 sm:$0xff] }
  0x43   : > { %381 = vmatpush.msra.mxu1 %v1167_v36  ;;  %417 = vmatpush.msra.mxu2 %v1165_v35 }
  0x44   : > { %356 = vmatpush.msra.mxu0 %v302_v37  ;;  %462 = vmatpush.msra.mxu3 %v302_v37 }
  0x45   : > { %382 = vmatpush.msra.mxu1 %v1173_v40  ;;  %418 = vmatpush.msra.mxu2 %v1176_v41 }
  0x46   : > { %357 = vmatpush.msra.mxu0 %v301_v42  ;;  %463 = vmatpush.msra.mxu3 %v301_v42 }
  0x47   : > { %383 = vmatpush.msra.mxu1 %v1179_v43  ;;  %419 = vmatpush.msra.mxu2 %v1182_v46 }
  0x48   : > { %358 = vmatpush.msra.mxu0 %v300_v47  ;;  %464 = vmatpush.msra.mxu3 %v300_v47 }
  0x49   : > { %384 = vmatpush.msra.mxu1 %v1185_v50  ;;  %420 = vmatpush.msra.mxu2 %v1188_v51 }
  0x4a   : > { %359 = vmatpush.msra.mxu0 %v299_v52  ;;  %421 = vmatmul.f32.vlgmr.msra.gmra.mxu2 %v399_v53 }
  0x4b   : > { %385 = vmatpush.msra.mxu1 %v1192_v54  ;;  %360 = vmatmul.f32.vlgmr.msra.gmra.mxu0 %v338_v55 }
  0x4c   : > { %386 = vmatmul.f32.vlgmr.msra.gmra.mxu1 %v280_v38  ;;  %473 = vmatpush.msrb.mxu0 %v1103_v3 }
  0x4d   : > { %503 = vmatpush.msrb.mxu1 %v1098_v0  ;;  %700 = vmatpush.msrb.mxu2 %v1098_v0  ;;  %v793_v0 = vld [vmem:[%s1319_s2] ss:$0 sm:$0xff] }
  0x4e   : > { %465 = vmatpush.msra.mxu3 %v299_v52  ;;  %474 = vmatpush.msrb.mxu0 %v1108_v6 }
  0x4f   : > { %504 = vmatpush.msrb.mxu1 %v1100_v1  ;;  %701 = vmatpush.msrb.mxu2 %v1100_v1 }
  0x50   : > { %684 = vmatpush.msrb.mxu3 %v1103_v3  ;;  %475 = vmatpush.msrb.mxu0 %v1111_v8 }
  0x51   : > { %505 = vmatpush.msrb.mxu1 %v1106_v5  ;;  %702 = vmatpush.msrb.mxu2 %v1106_v5 }
  0x52   : > { %685 = vmatpush.msrb.mxu3 %v1108_v6  ;;  %424 = vmatmul.f32.gmra.mxu2 %v401_v59 }
  0x53   : > { %476 = vmatpush.msrb.mxu0 %v1117_v11  ;;  %506 = vmatpush.msrb.mxu1 %v1114_v9 }
  0x54   : > { %363 = vmatmul.f32.gmra.mxu0 %v340_v60  ;;  %389 = vmatmul.f32.gmra.mxu1 %v281_v39 }
  0x55   : > { %477 = vmatpush.msrb.mxu0 %v1123_v14  ;;  %703 = vmatpush.msrb.mxu2 %v1114_v9 }
  0x56   : > { %686 = vmatpush.msrb.mxu3 %v1111_v8  ;;  %507 = vmatpush.msrb.mxu1 %v1120_v12 }
  0x57   : > { %478 = vmatpush.msrb.mxu0 %v1129_v17  ;;  %704 = vmatpush.msrb.mxu2 %v1120_v12 }
  0x58   : > { %687 = vmatpush.msrb.mxu3 %v1117_v11  ;;  %508 = vmatpush.msrb.mxu1 %v1126_v15 }
  0x59   : > { %479 = vmatpush.msrb.mxu0 %v1135_v20  ;;  %705 = vmatpush.msrb.mxu2 %v1126_v15 }
  0x5a   : > { %688 = vmatpush.msrb.mxu3 %v1123_v14  ;;  %427 = vmatmul.f32.gmra.mxu2 %v400_v57 }
  0x5b   : > { %480 = vmatpush.msrb.mxu0 %v1141_v23  ;;  %509 = vmatpush.msrb.mxu1 %v1132_v18 }
  0x5c   : > { %366 = vmatmul.f32.gmra.mxu0 %v339_v58  ;;  %392 = vmatmul.f32.gmra.mxu1 %v282_v56 }
  0x5d   : > { %481 = vmatpush.msrb.mxu0 %v1147_v26  ;;  %706 = vmatpush.msrb.mxu2 %v1132_v18 }
  0x5e   : > { %689 = vmatpush.msrb.mxu3 %v1129_v17  ;;  %510 = vmatpush.msrb.mxu1 %v1138_v21 }
  0x5f   : > { %482 = vmatpush.msrb.mxu0 %v1153_v29  ;;  %707 = vmatpush.msrb.mxu2 %v1138_v21 }
  0x60   : > { %690 = vmatpush.msrb.mxu3 %v1135_v20  ;;  %511 = vmatpush.msrb.mxu1 %v1144_v24 }
  0x61   : > { %483 = vmatpush.msrb.mxu0 %v1159_v32  ;;  %708 = vmatpush.msrb.mxu2 %v1144_v24 }
  0x62   : > { %691 = vmatpush.msrb.mxu3 %v1141_v23  ;;  %512 = vmatpush.msrb.mxu1 %v1150_v27 }
  0x63   : > { %484 = vmatpush.msrb.mxu0 %v1167_v36  ;;  %709 = vmatpush.msrb.mxu2 %v1150_v27 }
  0x64   : > { %692 = vmatpush.msrb.mxu3 %v1147_v26  ;;  %513 = vmatpush.msrb.mxu1 %v1156_v30 }
  0x65   : > { %485 = vmatpush.msrb.mxu0 %v1173_v40  ;;  %710 = vmatpush.msrb.mxu2 %v1156_v30 }
  0x66   : > { %693 = vmatpush.msrb.mxu3 %v1153_v29  ;;  %514 = vmatpush.msrb.mxu1 %v1162_v33 }
  0x67   : > { %486 = vmatpush.msrb.mxu0 %v1179_v43  ;;  %711 = vmatpush.msrb.mxu2 %v1162_v33 }
  0x68   : > { %694 = vmatpush.msrb.mxu3 %v1159_v32  ;;  %515 = vmatpush.msrb.mxu1 %v1165_v35  ;;  %v794_v32 = vld [vmem:[%s1320_s3] ss:$0 sm:$0xff] }
  0x69   : > { %487 = vmatpush.msrb.mxu0 %v1185_v50  ;;  %712 = vmatpush.msrb.mxu2 %v1165_v35 }
  0x6a   : > { %695 = vmatpush.msrb.mxu3 %v1167_v36  ;;  %516 = vmatpush.msrb.mxu1 %v1176_v41 }
  0x6b   : > { %488 = vmatpush.msrb.mxu0 %v1192_v54  ;;  %713 = vmatpush.msrb.mxu2 %v1176_v41 }
  0x6c   : > { %696 = vmatpush.msrb.mxu3 %v1173_v40  ;;  %517 = vmatpush.msrb.mxu1 %v1182_v46 }
  0x6d   : > { %714 = vmatpush.msrb.mxu2 %v1182_v46 }
  0x6e   : > { %697 = vmatpush.msrb.mxu3 %v1179_v43  ;;  %518 = vmatpush.msrb.mxu1 %v1188_v51 }
  0x6f   : > { %715 = vmatpush.msrb.mxu2 %v1188_v51 }
  0x70   : > { %698 = vmatpush.msrb.mxu3 %v1185_v50 }
  0x72   : > { %699 = vmatpush.msrb.mxu3 %v1192_v54 }
  0xc8   : > { %v361_v61 = vpop.f32.mrf.mxu0 }
  0xc9   : > { %v387_v62 = vpop.f32.mrf.mxu1 }
  0xca   : > { %v388_v63 = vadd.f32 %v387_v62, %v361_v61 }
  0xcd   : > { %v422_v1 = vpop.f32.mrf.mxu2 }
  0xce   : > { %v431_v2 = vadd.f32 %v422_v1, %v388_v63 }
  0xd0   : > { %v437_v3 = vadd.f32 %v793_v0, %v431_v2 }
  0xd1   : > { %v364_v4 = vpop.f32.mrf.mxu0  ;;  %v390_v5 = vpop.f32.mrf.mxu1 }
  0xd2   : > { %489 = vmatmul.f32.vlgmr.msrb.gmra.mxu0 %v437_v3  ;;  %v391_v6 = vadd.f32 %v390_v5, %v364_v4  ;;  %v443_v12 = vrot.slane %v437_v3, 1  ;;  %v496_v15 = vrot.slane %v437_v3, 2 }
  0xd5   : > { %v425_v7 = vpop.f32.mrf.mxu2 }
  0xd6   : > { %v432_v8 = vadd.f32 %v425_v7, %v391_v6 }
  0xd8   : > { %v438_v9 = vadd.f32 %v793_v0, %v432_v8 }
  0xd9   : > { %v367_v10 = vpop.f32.mrf.mxu0  ;;  %v393_v11 = vpop.f32.mrf.mxu1 }
  0xda   : > { %v394_v13 = vadd.f32 %v393_v11, %v367_v10  ;;  %v444_v14 = vrot.slane %v438_v9, 1  ;;  %v497_v16 = vrot.slane %v438_v9, 2 }
  0xdc   : > { %v445_v17 = vsel %vm335_vm1, %v443_v12, %v444_v14  ;;  %v498_v18 = vsel %vm396_vm0, %v496_v15, %v497_v16 }
  0xdd   : > { %v428_v19 = vpop.f32.mrf.mxu2  ;;  %466 = vmatmul.f32.vlgmr.msra.gmra.mxu3 %v445_v17  ;;  %519 = vmatmul.f32.vlgmr.msrb.gmra.mxu1 %v498_v18 }
  0xde   : > { %v433_v20 = vadd.f32 %v428_v19, %v394_v13 }
  0xe0   : > { %v439_v21 = vadd.f32 %v793_v0, %v433_v20 }
  0xe2   : > { %v446_v22 = vrot.slane %v439_v21, 1  ;;  %v499_v23 = vrot.slane %v439_v21, 2 }
  0xe4   : > { %v447_v24 = vsel %vm335_vm1, %v444_v14, %v446_v22  ;;  %v500_v25 = vsel %vm396_vm0, %v497_v16, %v499_v23 }
  0xe5   : > { %469 = vmatmul.f32.gmra.mxu3 %v447_v24  ;;  %522 = vmatmul.f32.vlgmr.msrb.gmra.mxu2 %v500_v25 }
  0xed   : > { %492 = vmatmul.f32.vlgmr.msrb.gmra.mxu3 %v438_v9 }
 0x14f   : > { %v490_v26 = vpop.f32.mrf.mxu0 }
 0x15a   : > { %v520_v29 = vpop.f32.mrf.mxu1 }
 0x160   : > { %v467_v27 = vpop.f32.mrf.mxu3 }
 0x161   : > { %v491_v28 = vadd.f32 %v490_v26, %v467_v27 }
 0x163   : > { %v526_v30 = vadd.f32 %v520_v29, %v491_v28 }
 0x165   : > { %v528_v31 = vadd.f32 %v793_v0, %v526_v30 }
 0x167   : > { %vm530_vm2 = vcmp.gt.f32.partialorder %v528_v31, 0.0  ;;  %v532_v33 = vmul.f32 0.01, %v528_v31 }
 0x168   : > { %v470_v35 = vpop.f32.mrf.mxu3  ;;  %v523_v41 = vpop.f32.mrf.mxu2 }
 0x169   : > { %v534_v36 = vsel %vm530_vm2, %v528_v31, %v532_v33 }
 0x16a   : > { %v540_v37 = vmul.f32 %v794_v32, %v534_v36 }
 0x16c   : > { %v546_v38 = vadd.f32 %v795_v34, %v540_v37 }
 0x16e   : > { %548 = vst [vmem:[%s279_s15] sm:$0xff] %v546_v38 }
 0x170   : > { %v493_v39 = vpop.f32.mrf.mxu3 }
 0x171   : > { %v494_v40 = vadd.f32 %v493_v39, %v470_v35 }
 0x173   : > { %v527_v42 = vadd.f32 %v523_v41, %v494_v40 }
 0x175   : > { %v529_v43 = vadd.f32 %v793_v0, %v527_v42 }
 0x177   : > { %vm531_vm3 = vcmp.gt.f32.partialorder %v529_v43, 0.0  ;;  %v533_v44 = vmul.f32 0.01, %v529_v43 }
 0x179   : > { %v535_v45 = vsel %vm531_vm3, %v529_v43, %v533_v44 }
 0x17a   : > { %v541_v46 = vmul.f32 %v794_v32, %v535_v45 }
 0x17c   : > { %v547_v47 = vadd.f32 %v795_v34, %v541_v46 }
 0x17e   : > { %549 = vst [vmem:[%s279_s15 + $0x8] sm:$0xff] %v547_v47 }
 0x17f   : > { %883 = shalt.err (!%p880_p0)
}
 0x180   : > { %s947_s14 = smov 128   ;;  %s948_s8 = smov 8  }
 0x181   : > { %722 = dma.vmem_to_hbm [thread:$0]  (%p1061_p5), %s566_s10, 256, %s568_s27, %s551_s11, %s947_s14, %s947_s14, %s948_s8  }
 0x182 PF: > { %s1341_s12 = sld [smem:[#allocation11_spill]]  ;;  %s582_s13 = sand.u32 1, %s922_s18  }
 0x183   : > { %p733_p3 = pnand %p669_p11, %p1028_p6  ;;  %s583_s15 = scalar_lea.sflag [#allocation4], %s582_s13 }
 0x185   : > { %p734_p7 = pneg %p733_p3 }
 0x187   : > { %917 = dma.done.wait (%p734_p7), %s583_s15, 256  }
 0x188   : > { %919 = vsyncadd (%p734_p7), %s583_s15, 4294967040  ;;  %s22_s23 = sadd.s32 1, %s1341_s12   ;;  %s1342_s16 = sld [smem:[#allocation12_spill]] }
 0x189   : > { %p19_p9 = scmp.ge.s32.totalorder %s22_s23, 4   ;;  %s1343_s18 = smov %s926_s19 }
 0x18a   : > { %s1344_s19 = smov %s930_s20  ;;  %s1345_s20 = smov %s1070_s30 }
 0x18b   : > { %s1346_s21 = smov %s938_s22  ;;  %21 = sbr.rel (!%p19_p9) target bundleno = 9 (0x9), region = 89 }
 0x18e   : > { %s1347_s22 = smov %s1342_s16 }
 0x190   :  { %589 = vsyncpa [#allocation3], 1 }
 0x191   :  { %591 = vsyncpa [#allocation3 + $0x1], 1 }
 0x192   :  { %592 = vsyncpa [#allocation6], 1 }
 0x193   :  { %593 = vsyncpa [#allocation4], 1 }
 0x194   :  { %595 = vsyncpa [#allocation4 + $0x1], 1 }

</bundles_post_ra>
